<compile_context>
chip_gen: v5e
topology: v5e:2x2
jax: 0.10.0
libtpu: 0.0.40
codegen_flags: <defaults>
</compile_context>

<pallas_src>
import functools

import jax
import jax.numpy as jnp
from jax.experimental import pallas as pl
from jax.experimental.pallas import tpu as pltpu


def _round_up(x: int, m: int) -> int:
    return (x + m - 1) // m * m


def _vmem_cap_bytes() -> int:
    """Physical VMEM per TensorCore; 64 MiB fallback covers v7x (the smallest)."""
    try:
        info = pltpu.get_tpu_info()
        cap = getattr(info, "vmem_capacity_bytes", None)
        if cap:
            return int(cap)
    except Exception:
        pass
    return 64 * 1024 * 1024


def fasttext_kernel(tok_ref, emb_ref, w1_ref, b1_ref, w2_ref, b2_ref, out_ref,
                    acc_ref, *, padding_idx: int):
    """Grid: (batch tiles ["parallel"], vocab tiles ["arbitrary", innermost])."""
    k = pl.program_id(1)
    nk = pl.num_programs(1)
    TB, S = tok_ref.shape
    TV = emb_ref.shape[0]

    @pl.when(k == 0)
    def _():
        acc_ref[...] = jnp.zeros_like(acc_ref)

    tok = tok_ref[...]                                          # (TB, S) int32
    v0 = k * TV
    lane_ids = jax.lax.broadcasted_iota(jnp.int32, (TB, TV), 1) + v0

    # Bag-of-words counts for this vocab tile, built with a short unrolled
    # loop over sequence positions (only one (TB, TV) tile live at a time;
    # the old fully-materialized (TB, S, Vp) one-hot spilled to VMEM).
    # NOTE: token ids outside [0, V) contribute nothing (they match no column).
    counts = jnp.zeros((TB, TV), jnp.float32)
    for s in range(S):                        # S is small & static -> unrolled
        t = tok[:, s:s + 1]                                     # (TB, 1)
        hit = jnp.logical_and(t == lane_ids, t != padding_idx)
        counts = counts + hit.astype(jnp.float32)

    # Partial masked sum == counts @ emb_tile (MXU), accumulated over vocab tiles.
    acc_ref[...] += jnp.dot(counts.astype(emb_ref.dtype), emb_ref[...],
                            preferred_element_type=jnp.float32)

    @pl.when(k == nk - 1)
    def _():
        n_valid = jnp.sum((tok != padding_idx).astype(jnp.float32),
                          axis=1, keepdims=True)                # (TB, 1)
        inv = pl.reciprocal(jnp.maximum(n_valid, 1e-13), approx=False)  # EUP
        mean = acc_ref[...] * inv                               # (TB, Ep) f32

        # dropout: eval-mode identity
        h = jnp.dot(mean.astype(w1_ref.dtype), w1_ref[...],
                    preferred_element_type=jnp.float32)
        h = jnp.maximum(h + b1_ref[...], 0.0)
        out = jnp.dot(h.astype(w2_ref.dtype), w2_ref[...],
                      preferred_element_type=jnp.float32)
        out_ref[...] = (out + b2_ref[...]).astype(out_ref.dtype)


def fasttext_forward(tokens, emb_table, w1, b1, w2, b2, padding_idx=0,
                     param_dtype=jnp.float32):
    """tokens: (B, S) int; emb_table: (V, E); w1: (E, E), w2: (C, E) in
    PyTorch (out, in) layout; b1: (E,), b2: (C,).  Returns (B, C) f32 logits."""
    # TODO(synk): for very large vocabularies (V >> S) a row-gather path (scalar-prefetch token ids + per-row embedding DMA) would avoid the O(B*V*E) bag-of-words matmul; only the vocab-tiled BoW path is implemented.
    B, S = tokens.shape
    V, E = emb_table.shape
    C = w2.shape[0]
    dsize = jnp.dtype(param_dtype).itemsize

    # Lane-dense padded dims; vocab tiled to bound per-step VMEM / vreg usage.
    Ep = _round_up(E, 128)
    Cp = _round_up(C, 128)
    TV = min(512, _round_up(V, 128))
    Vp = _round_up(V, TV)

    # Batch tile: 256 rows feed the 256-wide v6e/v7x MXU for big batches
    # (128 otherwise, which also matches the v5e 128-wide MXU); shrink / pad so
    # the grid has >= 2 batch steps and both v7x TensorCores get work.
    B8 = _round_up(B, 8)
    TB = min(256 if B >= 256 else 128, B8)
    if B8 // TB < 2 and TB >= 16:
        TB = max(8, (TB // 2) // 8 * 8)
    Bp = _round_up(B, TB)
    if Bp // TB < 2:
        Bp = 2 * TB                          # dummy rows are all padding_idx

    # Pad tokens; padded rows contribute nothing and are sliced off at the end.
    tok_p = jnp.full((Bp, S), padding_idx, dtype=jnp.int32)
    tok_p = tok_p.at[:B, :].set(tokens.astype(jnp.int32))

    # Zero-pad parameters; Linear weights pre-transposed to (in, out).
    emb_p = jnp.zeros((Vp, Ep), param_dtype).at[:V, :E].set(
        emb_table.astype(param_dtype))
    w1_p = jnp.zeros((Ep, Ep), param_dtype).at[:E, :E].set(
        w1.T.astype(param_dtype))
    b1_p = jnp.zeros((1, Ep), jnp.float32).at[:, :E].set(
        b1.astype(jnp.float32)[None, :])
    w2_p = jnp.zeros((Ep, Cp), param_dtype).at[:E, :C].set(
        w2.T.astype(param_dtype))
    b2_p = jnp.zeros((1, Cp), jnp.float32).at[:, :C].set(
        b2.astype(jnp.float32)[None, :])

    kernel = functools.partial(fasttext_kernel, padding_idx=padding_idx)
    n_btiles, n_vtiles = Bp // TB, Vp // TV

    # VMEM budget: actual footprint (weights, double-buffered streamed tiles,
    # accumulator scratch, live intermediates) + margin, clamped to the chip.
    needed = (2 * (Ep * Ep + Ep * Cp) * dsize + 2 * (Ep + Cp) * 4   # fc weights/biases
              + 2 * TV * Ep * dsize                                 # emb tile (dbl buf)
              + 2 * TB * S * 4 + 2 * TB * Cp * 4                    # tokens / out
              + TB * Ep * 4                                         # accumulator scratch
              + TB * (TV + 2 * Ep + Cp) * 4                         # live temporaries
              + (4 << 20))                                          # headroom
    vmem_limit = int(min(needed, int(0.9 * _vmem_cap_bytes())))

    flops = 2 * Bp * Vp * Ep + 2 * Bp * (Ep * Ep + Ep * Cp)
    bytes_accessed = (Bp * S * 4 + n_btiles * Vp * Ep * dsize
                      + (Ep * Ep + Ep * Cp) * dsize + (Ep + Cp) * 4 + Bp * Cp * 4)

    def _invoke(single_buffer_weights: bool):
        const_kw = ({"pipeline_mode": pl.Buffered(1)}
                    if single_buffer_weights else {})
        in_specs = [
            pl.BlockSpec((TB, S), lambda i, k: (i, 0)),                 # token tile
            pl.BlockSpec((TV, Ep), lambda i, k: (k, 0)),                # emb vocab tile
            pl.BlockSpec((Ep, Ep), lambda i, k: (0, 0), **const_kw),    # fc1 W (resident)
            pl.BlockSpec((1, Ep), lambda i, k: (0, 0), **const_kw),     # fc1 b
            pl.BlockSpec((Ep, Cp), lambda i, k: (0, 0), **const_kw),    # fc2 W (resident)
            pl.BlockSpec((1, Cp), lambda i, k: (0, 0), **const_kw),     # fc2 b
        ]
        return pl.pallas_call(
            kernel,
            out_shape=jax.ShapeDtypeStruct((Bp, Cp), jnp.float32),
            grid=(n_btiles, n_vtiles),
            in_specs=in_specs,
            out_specs=pl.BlockSpec((TB, Cp), lambda i, k: (i, 0)),
            scratch_shapes=[pltpu.VMEM((TB, Ep), jnp.float32)],
            compiler_params=pltpu.CompilerParams(
                dimension_semantics=("parallel", "arbitrary"),
                vmem_limit_bytes=vmem_limit),
            cost_estimate=pl.CostEstimate(
                flops=int(flops), transcendentals=0,
                bytes_accessed=int(bytes_accessed)),
        )(tok_p, emb_p, w1_p, b1_p, w2_p, b2_p)

    try:
        out = _invoke(True)        # single-buffer the constant classifier weights
    except Exception:
        out = _invoke(False)       # pl.Buffered(1) unsupported -> default buffering

    return out[:B, :C]


def reference_forward(tokens, emb_table, w1, b1, w2, b2, padding_idx=0):
    embedded = jnp.take(emb_table, tokens, axis=0).astype(jnp.float32)
    mask = (tokens != padding_idx).astype(jnp.float32)
    summed = jnp.sum(embedded * mask[:, :, None], axis=1)
    count = jnp.sum(mask, axis=1, keepdims=True)
    mean = summed / jnp.maximum(count, 1e-13)
    h = jnp.maximum(mean @ w1.T + b1, 0.0)
    return h @ w2.T + b2


if __name__ == "__main__":
    padding_idx = 0
    B, S, E, C = 8, 16, 128, 8

    key = jax.random.PRNGKey(0)
    k_tok, k_tok2, k_emb, k_w1, k_b1, k_w2, k_b2 = jax.random.split(key, 7)

    bound = 1.0 / float(E) ** 0.5
    w1 = jax.random.uniform(k_w1, (E, E), minval=-bound, maxval=bound, dtype=jnp.float32)
    b1 = jax.random.uniform(k_b1, (E,), minval=-bound, maxval=bound, dtype=jnp.float32)
    w2 = jax.random.uniform(k_w2, (C, E), minval=-bound, maxval=bound, dtype=jnp.float32)
    b2 = jax.random.uniform(k_b2, (C,), minval=-bound, maxval=bound, dtype=jnp.float32)

    pad_cols = jnp.arange(S) >= (S - 3)          # last 3 positions are padding

    # ---- Test 1: small vocab, f32 params (single vocab tile) -----------------
    V1 = 100
    emb1 = jax.random.normal(k_emb, (V1, E), dtype=jnp.float32)
    emb1 = emb1.at[padding_idx].set(0.0)         # nn.Embedding padding_idx row
    tok1 = jax.random.randint(k_tok, (B, S), minval=1, maxval=V1, dtype=jnp.int32)
    tok1 = jnp.where(pad_cols[None, :], padding_idx, tok1)

    out1 = jax.block_until_ready(
        fasttext_forward(tok1, emb1, w1, b1, w2, b2, padding_idx))
    ref1 = reference_forward(tok1, emb1, w1, b1, w2, b2, padding_idx)
    assert out1.shape == (B, C)
    assert jnp.allclose(out1, ref1, atol=1e-4, rtol=1e-4), "f32 path mismatch"

    # ---- Test 2: larger vocab, bf16 params (2 vocab tiles, accumulator path) -
    V2 = 1000
    emb2 = jax.random.normal(k_emb, (V2, E), dtype=jnp.float32)
    emb2 = emb2.at[padding_idx].set(0.0)
    tok2 = jax.random.randint(k_tok2, (B, S), minval=1, maxval=V2, dtype=jnp.int32)
    tok2 = jnp.where(pad_cols[None, :], padding_idx, tok2)

    out2 = jax.block_until_ready(
        fasttext_forward(tok2, emb2, w1, b1, w2, b2, padding_idx,
                         param_dtype=jnp.bfloat16))
    # Reference with bf16-rounded parameters (so the comparison isolates the
    # kernel's accumulation path rather than the intentional weight rounding).
    rnd = lambda a: a.astype(jnp.bfloat16).astype(jnp.float32)
    ref2 = reference_forward(tok2, rnd(emb2), rnd(w1), b1, rnd(w2), b2, padding_idx)
    assert out2.shape == (B, C)
    assert jnp.allclose(out2, ref2, atol=1e-2, rtol=1e-2), "bf16 path mismatch"

    print("KERNEL_OK")
</pallas_src>

<mosaic_0001>
module attributes {stable_mosaic.version = 11 : i64} {
  func.func @fasttext_kernel(%arg0: i32, %arg1: i32, %arg2: memref<8x16xi32, #tpu.memory_space<vmem>>, %arg3: memref<128x128xf32, #tpu.memory_space<vmem>>, %arg4: memref<128x128xf32, #tpu.memory_space<vmem>>, %arg5: memref<1x128xf32, #tpu.memory_space<vmem>>, %arg6: memref<128x128xf32, #tpu.memory_space<vmem>>, %arg7: memref<1x128xf32, #tpu.memory_space<vmem>>, %arg8: memref<8x128xf32, #tpu.memory_space<vmem>>, %arg9: memref<8x128xf32, #tpu.memory_space<vmem>>) attributes {dimension_semantics = [#tpu.dimension_semantics<parallel>, #tpu.dimension_semantics<arbitrary>], iteration_bounds = array<i64: 2, 1>, scalar_prefetch = 0 : i64, scratch_operands = 1 : i64, tpu.core_type = #tpu.core_type<tc>, window_params = [{transform_indices = @transform_0, window_bounds = array<i64: 8, 16>}, {transform_indices = @transform_1, window_bounds = array<i64: 128, 128>}, {pipeline_mode = #tpu.pipeline_mode<synchronous>, transform_indices = @transform_2, window_bounds = array<i64: 128, 128>}, {pipeline_mode = #tpu.pipeline_mode<synchronous>, transform_indices = @transform_3, window_bounds = array<i64: 1, 128>}, {pipeline_mode = #tpu.pipeline_mode<synchronous>, transform_indices = @transform_4, window_bounds = array<i64: 128, 128>}, {pipeline_mode = #tpu.pipeline_mode<synchronous>, transform_indices = @transform_5, window_bounds = array<i64: 1, 128>}, {transform_indices = @transform_6, window_bounds = array<i64: 8, 128>}]} {
    %c0_i32 = arith.constant 0 : i32
    %0 = arith.cmpi eq, %arg1, %c0_i32 : i32
    %1 = arith.extui %0 : i1 to i32
    %c0_i32_0 = arith.constant 0 : i32
    %2 = arith.cmpi ne, %1, %c0_i32_0 : i32
    scf.if %2 {
      %cst_27 = arith.constant 0.000000e+00 : f32
      %177 = vector.broadcast %cst_27 : f32 to vector<8x128xf32>
      %c0_28 = arith.constant 0 : index
      %c0_29 = arith.constant 0 : index
      %178 = vector.load %arg9[%c0_28, %c0_29] : memref<8x128xf32, #tpu.memory_space<vmem>>, vector<8x128xf32>
      tpu.vector_store %arg9[%c0_28, %c0_29], %177 {strides = array<i32>} : memref<8x128xf32, #tpu.memory_space<vmem>>, vector<8x128xf32>,
    } else {
    }
    %c0 = arith.constant 0 : index
    %c0_1 = arith.constant 0 : index
    %3 = vector.load %arg2[%c0, %c0_1] : memref<8x16xi32, #tpu.memory_space<vmem>>, vector<8x16xi32>
    %c128_i32 = arith.constant 128 : i32
    %4 = arith.muli %arg1, %c128_i32 : i32
    %5 = tpu.iota {dimensions = array<i32: 1>} : vector<8x128xi32>
    %6 = vector.broadcast %4 : i32 to vector<8x128xi32>
    %7 = arith.addi %5, %6 : vector<8x128xi32>
    %cst = arith.constant 0.000000e+00 : f32
    %8 = vector.broadcast %cst : f32 to vector<8x128xf32>
    %9 = vector.extract_strided_slice %3 {offsets = [0, 0], sizes = [8, 1], strides = [1, 1]} : vector<8x16xi32> to vector<8x1xi32>
    %10 = vector.broadcast %9 : vector<8x1xi32> to vector<8x128xi32>
    %11 = arith.cmpi eq, %10, %7 : vector<8x128xi32>
    %c0_i32_2 = arith.constant 0 : i32
    %12 = vector.broadcast %c0_i32_2 : i32 to vector<8x1xi32>
    %13 = arith.cmpi ne, %9, %12 : vector<8x1xi32>
    %14 = vector.broadcast %13 : vector<8x1xi1> to vector<8x128xi1>
    %15 = arith.andi %11, %14 : vector<8x128xi1>
    %16 = arith.extui %15 : vector<8x128xi1> to vector<8x128xi32>
    %17 = arith.sitofp %16 : vector<8x128xi32> to vector<8x128xf32>
    %18 = arith.addf %8, %17 : vector<8x128xf32>
    %19 = vector.extract_strided_slice %3 {offsets = [0, 1], sizes = [8, 1], strides = [1, 1]} : vector<8x16xi32> to vector<8x1xi32>
    %20 = vector.broadcast %19 : vector<8x1xi32> to vector<8x128xi32>
    %21 = arith.cmpi eq, %20, %7 : vector<8x128xi32>
    %c0_i32_3 = arith.constant 0 : i32
    %22 = vector.broadcast %c0_i32_3 : i32 to vector<8x1xi32>
    %23 = arith.cmpi ne, %19, %22 : vector<8x1xi32>
    %24 = vector.broadcast %23 : vector<8x1xi1> to vector<8x128xi1>
    %25 = arith.andi %21, %24 : vector<8x128xi1>
    %26 = arith.extui %25 : vector<8x128xi1> to vector<8x128xi32>
    %27 = arith.sitofp %26 : vector<8x128xi32> to vector<8x128xf32>
    %28 = arith.addf %18, %27 : vector<8x128xf32>
    %29 = vector.extract_strided_slice %3 {offsets = [0, 2], sizes = [8, 1], strides = [1, 1]} : vector<8x16xi32> to vector<8x1xi32>
    %30 = vector.broadcast %29 : vector<8x1xi32> to vector<8x128xi32>
    %31 = arith.cmpi eq, %30, %7 : vector<8x128xi32>
    %c0_i32_4 = arith.constant 0 : i32
    %32 = vector.broadcast %c0_i32_4 : i32 to vector<8x1xi32>
    %33 = arith.cmpi ne, %29, %32 : vector<8x1xi32>
    %34 = vector.broadcast %33 : vector<8x1xi1> to vector<8x128xi1>
    %35 = arith.andi %31, %34 : vector<8x128xi1>
    %36 = arith.extui %35 : vector<8x128xi1> to vector<8x128xi32>
    %37 = arith.sitofp %36 : vector<8x128xi32> to vector<8x128xf32>
    %38 = arith.addf %28, %37 : vector<8x128xf32>
    %39 = vector.extract_strided_slice %3 {offsets = [0, 3], sizes = [8, 1], strides = [1, 1]} : vector<8x16xi32> to vector<8x1xi32>
    %40 = vector.broadcast %39 : vector<8x1xi32> to vector<8x128xi32>
    %41 = arith.cmpi eq, %40, %7 : vector<8x128xi32>
    %c0_i32_5 = arith.constant 0 : i32
    %42 = vector.broadcast %c0_i32_5 : i32 to vector<8x1xi32>
    %43 = arith.cmpi ne, %39, %42 : vector<8x1xi32>
    %44 = vector.broadcast %43 : vector<8x1xi1> to vector<8x128xi1>
    %45 = arith.andi %41, %44 : vector<8x128xi1>
    %46 = arith.extui %45 : vector<8x128xi1> to vector<8x128xi32>
    %47 = arith.sitofp %46 : vector<8x128xi32> to vector<8x128xf32>
    %48 = arith.addf %38, %47 : vector<8x128xf32>
    %49 = vector.extract_strided_slice %3 {offsets = [0, 4], sizes = [8, 1], strides = [1, 1]} : vector<8x16xi32> to vector<8x1xi32>
    %50 = vector.broadcast %49 : vector<8x1xi32> to vector<8x128xi32>
    %51 = arith.cmpi eq, %50, %7 : vector<8x128xi32>
    %c0_i32_6 = arith.constant 0 : i32
    %52 = vector.broadcast %c0_i32_6 : i32 to vector<8x1xi32>
    %53 = arith.cmpi ne, %49, %52 : vector<8x1xi32>
    %54 = vector.broadcast %53 : vector<8x1xi1> to vector<8x128xi1>
    %55 = arith.andi %51, %54 : vector<8x128xi1>
    %56 = arith.extui %55 : vector<8x128xi1> to vector<8x128xi32>
    %57 = arith.sitofp %56 : vector<8x128xi32> to vector<8x128xf32>
    %58 = arith.addf %48, %57 : vector<8x128xf32>
    %59 = vector.extract_strided_slice %3 {offsets = [0, 5], sizes = [8, 1], strides = [1, 1]} : vector<8x16xi32> to vector<8x1xi32>
    %60 = vector.broadcast %59 : vector<8x1xi32> to vector<8x128xi32>
    %61 = arith.cmpi eq, %60, %7 : vector<8x128xi32>
    %c0_i32_7 = arith.constant 0 : i32
    %62 = vector.broadcast %c0_i32_7 : i32 to vector<8x1xi32>
    %63 = arith.cmpi ne, %59, %62 : vector<8x1xi32>
    %64 = vector.broadcast %63 : vector<8x1xi1> to vector<8x128xi1>
    %65 = arith.andi %61, %64 : vector<8x128xi1>
    %66 = arith.extui %65 : vector<8x128xi1> to vector<8x128xi32>
    %67 = arith.sitofp %66 : vector<8x128xi32> to vector<8x128xf32>
    %68 = arith.addf %58, %67 : vector<8x128xf32>
    %69 = vector.extract_strided_slice %3 {offsets = [0, 6], sizes = [8, 1], strides = [1, 1]} : vector<8x16xi32> to vector<8x1xi32>
    %70 = vector.broadcast %69 : vector<8x1xi32> to vector<8x128xi32>
    %71 = arith.cmpi eq, %70, %7 : vector<8x128xi32>
    %c0_i32_8 = arith.constant 0 : i32
    %72 = vector.broadcast %c0_i32_8 : i32 to vector<8x1xi32>
    %73 = arith.cmpi ne, %69, %72 : vector<8x1xi32>
    %74 = vector.broadcast %73 : vector<8x1xi1> to vector<8x128xi1>
    %75 = arith.andi %71, %74 : vector<8x128xi1>
    %76 = arith.extui %75 : vector<8x128xi1> to vector<8x128xi32>
    %77 = arith.sitofp %76 : vector<8x128xi32> to vector<8x128xf32>
    %78 = arith.addf %68, %77 : vector<8x128xf32>
    %79 = vector.extract_strided_slice %3 {offsets = [0, 7], sizes = [8, 1], strides = [1, 1]} : vector<8x16xi32> to vector<8x1xi32>
    %80 = vector.broadcast %79 : vector<8x1xi32> to vector<8x128xi32>
    %81 = arith.cmpi eq, %80, %7 : vector<8x128xi32>
    %c0_i32_9 = arith.constant 0 : i32
    %82 = vector.broadcast %c0_i32_9 : i32 to vector<8x1xi32>
    %83 = arith.cmpi ne, %79, %82 : vector<8x1xi32>
    %84 = vector.broadcast %83 : vector<8x1xi1> to vector<8x128xi1>
    %85 = arith.andi %81, %84 : vector<8x128xi1>
    %86 = arith.extui %85 : vector<8x128xi1> to vector<8x128xi32>
    %87 = arith.sitofp %86 : vector<8x128xi32> to vector<8x128xf32>
    %88 = arith.addf %78, %87 : vector<8x128xf32>
    %89 = vector.extract_strided_slice %3 {offsets = [0, 8], sizes = [8, 1], strides = [1, 1]} : vector<8x16xi32> to vector<8x1xi32>
    %90 = vector.broadcast %89 : vector<8x1xi32> to vector<8x128xi32>
    %91 = arith.cmpi eq, %90, %7 : vector<8x128xi32>
    %c0_i32_10 = arith.constant 0 : i32
    %92 = vector.broadcast %c0_i32_10 : i32 to vector<8x1xi32>
    %93 = arith.cmpi ne, %89, %92 : vector<8x1xi32>
    %94 = vector.broadcast %93 : vector<8x1xi1> to vector<8x128xi1>
    %95 = arith.andi %91, %94 : vector<8x128xi1>
    %96 = arith.extui %95 : vector<8x128xi1> to vector<8x128xi32>
    %97 = arith.sitofp %96 : vector<8x128xi32> to vector<8x128xf32>
    %98 = arith.addf %88, %97 : vector<8x128xf32>
    %99 = vector.extract_strided_slice %3 {offsets = [0, 9], sizes = [8, 1], strides = [1, 1]} : vector<8x16xi32> to vector<8x1xi32>
    %100 = vector.broadcast %99 : vector<8x1xi32> to vector<8x128xi32>
    %101 = arith.cmpi eq, %100, %7 : vector<8x128xi32>
    %c0_i32_11 = arith.constant 0 : i32
    %102 = vector.broadcast %c0_i32_11 : i32 to vector<8x1xi32>
    %103 = arith.cmpi ne, %99, %102 : vector<8x1xi32>
    %104 = vector.broadcast %103 : vector<8x1xi1> to vector<8x128xi1>
    %105 = arith.andi %101, %104 : vector<8x128xi1>
    %106 = arith.extui %105 : vector<8x128xi1> to vector<8x128xi32>
    %107 = arith.sitofp %106 : vector<8x128xi32> to vector<8x128xf32>
    %108 = arith.addf %98, %107 : vector<8x128xf32>
    %109 = vector.extract_strided_slice %3 {offsets = [0, 10], sizes = [8, 1], strides = [1, 1]} : vector<8x16xi32> to vector<8x1xi32>
    %110 = vector.broadcast %109 : vector<8x1xi32> to vector<8x128xi32>
    %111 = arith.cmpi eq, %110, %7 : vector<8x128xi32>
    %c0_i32_12 = arith.constant 0 : i32
    %112 = vector.broadcast %c0_i32_12 : i32 to vector<8x1xi32>
    %113 = arith.cmpi ne, %109, %112 : vector<8x1xi32>
    %114 = vector.broadcast %113 : vector<8x1xi1> to vector<8x128xi1>
    %115 = arith.andi %111, %114 : vector<8x128xi1>
    %116 = arith.extui %115 : vector<8x128xi1> to vector<8x128xi32>
    %117 = arith.sitofp %116 : vector<8x128xi32> to vector<8x128xf32>
    %118 = arith.addf %108, %117 : vector<8x128xf32>
    %119 = vector.extract_strided_slice %3 {offsets = [0, 11], sizes = [8, 1], strides = [1, 1]} : vector<8x16xi32> to vector<8x1xi32>
    %120 = vector.broadcast %119 : vector<8x1xi32> to vector<8x128xi32>
    %121 = arith.cmpi eq, %120, %7 : vector<8x128xi32>
    %c0_i32_13 = arith.constant 0 : i32
    %122 = vector.broadcast %c0_i32_13 : i32 to vector<8x1xi32>
    %123 = arith.cmpi ne, %119, %122 : vector<8x1xi32>
    %124 = vector.broadcast %123 : vector<8x1xi1> to vector<8x128xi1>
    %125 = arith.andi %121, %124 : vector<8x128xi1>
    %126 = arith.extui %125 : vector<8x128xi1> to vector<8x128xi32>
    %127 = arith.sitofp %126 : vector<8x128xi32> to vector<8x128xf32>
    %128 = arith.addf %118, %127 : vector<8x128xf32>
    %129 = vector.extract_strided_slice %3 {offsets = [0, 12], sizes = [8, 1], strides = [1, 1]} : vector<8x16xi32> to vector<8x1xi32>
    %130 = vector.broadcast %129 : vector<8x1xi32> to vector<8x128xi32>
    %131 = arith.cmpi eq, %130, %7 : vector<8x128xi32>
    %c0_i32_14 = arith.constant 0 : i32
    %132 = vector.broadcast %c0_i32_14 : i32 to vector<8x1xi32>
    %133 = arith.cmpi ne, %129, %132 : vector<8x1xi32>
    %134 = vector.broadcast %133 : vector<8x1xi1> to vector<8x128xi1>
    %135 = arith.andi %131, %134 : vector<8x128xi1>
    %136 = arith.extui %135 : vector<8x128xi1> to vector<8x128xi32>
    %137 = arith.sitofp %136 : vector<8x128xi32> to vector<8x128xf32>
    %138 = arith.addf %128, %137 : vector<8x128xf32>
    %139 = vector.extract_strided_slice %3 {offsets = [0, 13], sizes = [8, 1], strides = [1, 1]} : vector<8x16xi32> to vector<8x1xi32>
    %140 = vector.broadcast %139 : vector<8x1xi32> to vector<8x128xi32>
    %141 = arith.cmpi eq, %140, %7 : vector<8x128xi32>
    %c0_i32_15 = arith.constant 0 : i32
    %142 = vector.broadcast %c0_i32_15 : i32 to vector<8x1xi32>
    %143 = arith.cmpi ne, %139, %142 : vector<8x1xi32>
    %144 = vector.broadcast %143 : vector<8x1xi1> to vector<8x128xi1>
    %145 = arith.andi %141, %144 : vector<8x128xi1>
    %146 = arith.extui %145 : vector<8x128xi1> to vector<8x128xi32>
    %147 = arith.sitofp %146 : vector<8x128xi32> to vector<8x128xf32>
    %148 = arith.addf %138, %147 : vector<8x128xf32>
    %149 = vector.extract_strided_slice %3 {offsets = [0, 14], sizes = [8, 1], strides = [1, 1]} : vector<8x16xi32> to vector<8x1xi32>
    %150 = vector.broadcast %149 : vector<8x1xi32> to vector<8x128xi32>
    %151 = arith.cmpi eq, %150, %7 : vector<8x128xi32>
    %c0_i32_16 = arith.constant 0 : i32
    %152 = vector.broadcast %c0_i32_16 : i32 to vector<8x1xi32>
    %153 = arith.cmpi ne, %149, %152 : vector<8x1xi32>
    %154 = vector.broadcast %153 : vector<8x1xi1> to vector<8x128xi1>
    %155 = arith.andi %151, %154 : vector<8x128xi1>
    %156 = arith.extui %155 : vector<8x128xi1> to vector<8x128xi32>
    %157 = arith.sitofp %156 : vector<8x128xi32> to vector<8x128xf32>
    %158 = arith.addf %148, %157 : vector<8x128xf32>
    %159 = vector.extract_strided_slice %3 {offsets = [0, 15], sizes = [8, 1], strides = [1, 1]} : vector<8x16xi32> to vector<8x1xi32>
    %160 = vector.broadcast %159 : vector<8x1xi32> to vector<8x128xi32>
    %161 = arith.cmpi eq, %160, %7 : vector<8x128xi32>
    %c0_i32_17 = arith.constant 0 : i32
    %162 = vector.broadcast %c0_i32_17 : i32 to vector<8x1xi32>
    %163 = arith.cmpi ne, %159, %162 : vector<8x1xi32>
    %164 = vector.broadcast %163 : vector<8x1xi1> to vector<8x128xi1>
    %165 = arith.andi %161, %164 : vector<8x128xi1>
    %166 = arith.extui %165 : vector<8x128xi1> to vector<8x128xi32>
    %167 = arith.sitofp %166 : vector<8x128xi32> to vector<8x128xf32>
    %168 = arith.addf %158, %167 : vector<8x128xf32>
    %c0_18 = arith.constant 0 : index
    %c0_19 = arith.constant 0 : index
    %169 = vector.load %arg9[%c0_18, %c0_19] : memref<8x128xf32, #tpu.memory_space<vmem>>, vector<8x128xf32>
    %c0_20 = arith.constant 0 : index
    %c0_21 = arith.constant 0 : index
    %170 = vector.load %arg3[%c0_20, %c0_21] : memref<128x128xf32, #tpu.memory_space<vmem>>, vector<128x128xf32>
    %cst_22 = arith.constant dense<0.000000e+00> : vector<8x128xf32>
    %171 = tpu.matmul %168, %170, %cst_22 {dimension_numbers = #tpu.dot_dimension_numbers<[1], [0], [0], [1], [0, 0, 1, 1], [], []>} : vector<8x128xf32>, vector<128x128xf32>, vector<8x128xf32> -> vector<8x128xf32>
    %172 = arith.addf %169, %171 : vector<8x128xf32>
    %c0_23 = arith.constant 0 : index
    %c0_24 = arith.constant 0 : index
    %173 = vector.load %arg9[%c0_23, %c0_24] : memref<8x128xf32, #tpu.memory_space<vmem>>, vector<8x128xf32>
    tpu.vector_store %arg9[%c0_23, %c0_24], %172 {strides = array<i32>} : memref<8x128xf32, #tpu.memory_space<vmem>>, vector<8x128xf32>,
    %c0_i32_25 = arith.constant 0 : i32
    %174 = arith.cmpi eq, %arg1, %c0_i32_25 : i32
    %175 = arith.extui %174 : i1 to i32
    %c0_i32_26 = arith.constant 0 : i32
    %176 = arith.cmpi ne, %175, %c0_i32_26 : i32
    scf.if %176 {
      %c0_i32_27 = arith.constant 0 : i32
      %177 = vector.broadcast %c0_i32_27 : i32 to vector<8x16xi32>
      %178 = arith.cmpi ne, %3, %177 : vector<8x16xi32>
      %179 = arith.extui %178 : vector<8x16xi1> to vector<8x16xi32>
      %180 = arith.sitofp %179 : vector<8x16xi32> to vector<8x16xf32>
      %cst_28 = arith.constant dense<0.000000e+00> : vector<8xf32>
      %181 = vector.multi_reduction <add>, %180, %cst_28 [1] : vector<8x16xf32> to vector<8xf32>
      %182 = vector.shape_cast %181 : vector<8xf32> to vector<8x1xf32>
      %cst_29 = arith.constant 9.99999982E-14 : f32
      %183 = vector.broadcast %cst_29 : f32 to vector<8x1xf32>
      %184 = arith.maximumf %182, %183 : vector<8x1xf32>
      %185 = tpu.reciprocal %184 : vector<8x1xf32> -> vector<8x1xf32>
      %c0_30 = arith.constant 0 : index
      %c0_31 = arith.constant 0 : index
      %186 = vector.load %arg9[%c0_30, %c0_31] : memref<8x128xf32, #tpu.memory_space<vmem>>, vector<8x128xf32>
      %187 = vector.broadcast %185 : vector<8x1xf32> to vector<8x128xf32>
      %188 = arith.mulf %186, %187 : vector<8x128xf32>
      %c0_32 = arith.constant 0 : index
      %c0_33 = arith.constant 0 : index
      %189 = vector.load %arg4[%c0_32, %c0_33] : memref<128x128xf32, #tpu.memory_space<vmem>>, vector<128x128xf32>
      %cst_34 = arith.constant dense<0.000000e+00> : vector<8x128xf32>
      %190 = tpu.matmul %188, %189, %cst_34 {dimension_numbers = #tpu.dot_dimension_numbers<[1], [0], [0], [1], [0, 0, 1, 1], [], []>} : vector<8x128xf32>, vector<128x128xf32>, vector<8x128xf32> -> vector<8x128xf32>
      %c0_35 = arith.constant 0 : index
      %c0_36 = arith.constant 0 : index
      %191 = vector.load %arg5[%c0_35, %c0_36] : memref<1x128xf32, #tpu.memory_space<vmem>>, vector<1x128xf32>
      %192 = vector.broadcast %191 : vector<1x128xf32> to vector<8x128xf32>
      %193 = arith.addf %190, %192 : vector<8x128xf32>
      %cst_37 = arith.constant 0.000000e+00 : f32
      %194 = vector.broadcast %cst_37 : f32 to vector<8x128xf32>
      %195 = arith.maximumf %193, %194 : vector<8x128xf32>
      %c0_38 = arith.constant 0 : index
      %c0_39 = arith.constant 0 : index
      %196 = vector.load %arg6[%c0_38, %c0_39] : memref<128x128xf32, #tpu.memory_space<vmem>>, vector<128x128xf32>
      %cst_40 = arith.constant dense<0.000000e+00> : vector<8x128xf32>
      %197 = tpu.matmul %195, %196, %cst_40 {dimension_numbers = #tpu.dot_dimension_numbers<[1], [0], [0], [1], [0, 0, 1, 1], [], []>} : vector<8x128xf32>, vector<128x128xf32>, vector<8x128xf32> -> vector<8x128xf32>
      %c0_41 = arith.constant 0 : index
      %c0_42 = arith.constant 0 : index
      %198 = vector.load %arg7[%c0_41, %c0_42] : memref<1x128xf32, #tpu.memory_space<vmem>>, vector<1x128xf32>
      %199 = vector.broadcast %198 : vector<1x128xf32> to vector<8x128xf32>
      %200 = arith.addf %197, %199 : vector<8x128xf32>
      %c0_43 = arith.constant 0 : index
      %c0_44 = arith.constant 0 : index
      %201 = vector.load %arg8[%c0_43, %c0_44] : memref<8x128xf32, #tpu.memory_space<vmem>>, vector<8x128xf32>
      tpu.vector_store %arg8[%c0_43, %c0_44], %200 {strides = array<i32>} : memref<8x128xf32, #tpu.memory_space<vmem>>, vector<8x128xf32>,
    } else {
    }
    return
  }
  func.func @transform_0(%arg0: i32, %arg1: i32) -> (i32, i32) {
    %c0_i32 = arith.constant 0 : i32
    %c0_i32_0 = arith.constant 0 : i32
    return %arg0, %c0_i32 : i32, i32
  }
  func.func @transform_1(%arg0: i32, %arg1: i32) -> (i32, i32) {
    %c0_i32 = arith.constant 0 : i32
    %c0_i32_0 = arith.constant 0 : i32
    return %arg1, %c0_i32 : i32, i32
  }
  func.func @transform_2(%arg0: i32, %arg1: i32) -> (i32, i32) {
    %c0_i32 = arith.constant 0 : i32
    %c0_i32_0 = arith.constant 0 : i32
    %c0_i32_1 = arith.constant 0 : i32
    return %c0_i32, %c0_i32_0 : i32, i32
  }
  func.func @transform_3(%arg0: i32, %arg1: i32) -> (i32, i32) {
    %c0_i32 = arith.constant 0 : i32
    %c0_i32_0 = arith.constant 0 : i32
    %c0_i32_1 = arith.constant 0 : i32
    return %c0_i32, %c0_i32_0 : i32, i32
  }
  func.func @transform_4(%arg0: i32, %arg1: i32) -> (i32, i32) {
    %c0_i32 = arith.constant 0 : i32
    %c0_i32_0 = arith.constant 0 : i32
    %c0_i32_1 = arith.constant 0 : i32
    return %c0_i32, %c0_i32_0 : i32, i32
  }
  func.func @transform_5(%arg0: i32, %arg1: i32) -> (i32, i32) {
    %c0_i32 = arith.constant 0 : i32
    %c0_i32_0 = arith.constant 0 : i32
    %c0_i32_1 = arith.constant 0 : i32
    return %c0_i32, %c0_i32_0 : i32, i32
  }
  func.func @transform_6(%arg0: i32, %arg1: i32) -> (i32, i32) {
    %c0_i32 = arith.constant 0 : i32
    %c0_i32_0 = arith.constant 0 : i32
    return %arg0, %c0_i32 : i32, i32
  }
}

module attributes {stable_mosaic.version = 11 : i64} {
  func.func @fasttext_kernel(%arg0: i32, %arg1: i32, %arg2: memref<8x16xi32, #tpu.memory_space<vmem>>, %arg3: memref<128x128xf32, #tpu.memory_space<vmem>>, %arg4: memref<128x128xf32, #tpu.memory_space<vmem>>, %arg5: memref<1x128xf32, #tpu.memory_space<vmem>>, %arg6: memref<128x128xf32, #tpu.memory_space<vmem>>, %arg7: memref<1x128xf32, #tpu.memory_space<vmem>>, %arg8: memref<8x128xf32, #tpu.memory_space<vmem>>, %arg9: memref<8x128xf32, #tpu.memory_space<vmem>>) attributes {dimension_semantics = [#tpu.dimension_semantics<parallel>, #tpu.dimension_semantics<arbitrary>], iteration_bounds = array<i64: 2, 1>, scalar_prefetch = 0 : i64, scratch_operands = 1 : i64, tpu.core_type = #tpu.core_type<tc>, window_params = [{transform_indices = @transform_0, window_bounds = array<i64: 8, 16>}, {transform_indices = @transform_1, window_bounds = array<i64: 128, 128>}, {pipeline_mode = #tpu.pipeline_mode<synchronous>, transform_indices = @transform_2, window_bounds = array<i64: 128, 128>}, {pipeline_mode = #tpu.pipeline_mode<synchronous>, transform_indices = @transform_3, window_bounds = array<i64: 1, 128>}, {pipeline_mode = #tpu.pipeline_mode<synchronous>, transform_indices = @transform_4, window_bounds = array<i64: 128, 128>}, {pipeline_mode = #tpu.pipeline_mode<synchronous>, transform_indices = @transform_5, window_bounds = array<i64: 1, 128>}, {transform_indices = @transform_6, window_bounds = array<i64: 8, 128>}]} {
    %c0_i32 = arith.constant 0 : i32
    %0 = arith.cmpi eq, %arg1, %c0_i32 : i32
    %1 = arith.extui %0 : i1 to i32
    %c0_i32_0 = arith.constant 0 : i32
    %2 = arith.cmpi ne, %1, %c0_i32_0 : i32
    scf.if %2 {
      %cst_27 = arith.constant 0.000000e+00 : f32
      %177 = vector.broadcast %cst_27 : f32 to vector<8x128xf32>
      %c0_28 = arith.constant 0 : index
      %c0_29 = arith.constant 0 : index
      %178 = vector.load %arg9[%c0_28, %c0_29] : memref<8x128xf32, #tpu.memory_space<vmem>>, vector<8x128xf32>
      tpu.vector_store %arg9[%c0_28, %c0_29], %177 {strides = array<i32>} : memref<8x128xf32, #tpu.memory_space<vmem>>, vector<8x128xf32>,
    } else {
    }
    %c0 = arith.constant 0 : index
    %c0_1 = arith.constant 0 : index
    %3 = vector.load %arg2[%c0, %c0_1] : memref<8x16xi32, #tpu.memory_space<vmem>>, vector<8x16xi32>
    %c128_i32 = arith.constant 128 : i32
    %4 = arith.muli %arg1, %c128_i32 : i32
    %5 = tpu.iota {dimensions = array<i32: 1>} : vector<8x128xi32>
    %6 = vector.broadcast %4 : i32 to vector<8x128xi32>
    %7 = arith.addi %5, %6 : vector<8x128xi32>
    %cst = arith.constant 0.000000e+00 : f32
    %8 = vector.broadcast %cst : f32 to vector<8x128xf32>
    %9 = vector.extract_strided_slice %3 {offsets = [0, 0], sizes = [8, 1], strides = [1, 1]} : vector<8x16xi32> to vector<8x1xi32>
    %10 = vector.broadcast %9 : vector<8x1xi32> to vector<8x128xi32>
    %11 = arith.cmpi eq, %10, %7 : vector<8x128xi32>
    %c0_i32_2 = arith.constant 0 : i32
    %12 = vector.broadcast %c0_i32_2 : i32 to vector<8x1xi32>
    %13 = arith.cmpi ne, %9, %12 : vector<8x1xi32>
    %14 = vector.broadcast %13 : vector<8x1xi1> to vector<8x128xi1>
    %15 = arith.andi %11, %14 : vector<8x128xi1>
    %16 = arith.extui %15 : vector<8x128xi1> to vector<8x128xi32>
    %17 = arith.sitofp %16 : vector<8x128xi32> to vector<8x128xf32>
    %18 = arith.addf %8, %17 : vector<8x128xf32>
    %19 = vector.extract_strided_slice %3 {offsets = [0, 1], sizes = [8, 1], strides = [1, 1]} : vector<8x16xi32> to vector<8x1xi32>
    %20 = vector.broadcast %19 : vector<8x1xi32> to vector<8x128xi32>
    %21 = arith.cmpi eq, %20, %7 : vector<8x128xi32>
    %c0_i32_3 = arith.constant 0 : i32
    %22 = vector.broadcast %c0_i32_3 : i32 to vector<8x1xi32>
    %23 = arith.cmpi ne, %19, %22 : vector<8x1xi32>
    %24 = vector.broadcast %23 : vector<8x1xi1> to vector<8x128xi1>
    %25 = arith.andi %21, %24 : vector<8x128xi1>
    %26 = arith.extui %25 : vector<8x128xi1> to vector<8x128xi32>
    %27 = arith.sitofp %26 : vector<8x128xi32> to vector<8x128xf32>
    %28 = arith.addf %18, %27 : vector<8x128xf32>
    %29 = vector.extract_strided_slice %3 {offsets = [0, 2], sizes = [8, 1], strides = [1, 1]} : vector<8x16xi32> to vector<8x1xi32>
    %30 = vector.broadcast %29 : vector<8x1xi32> to vector<8x128xi32>
    %31 = arith.cmpi eq, %30, %7 : vector<8x128xi32>
    %c0_i32_4 = arith.constant 0 : i32
    %32 = vector.broadcast %c0_i32_4 : i32 to vector<8x1xi32>
    %33 = arith.cmpi ne, %29, %32 : vector<8x1xi32>
    %34 = vector.broadcast %33 : vector<8x1xi1> to vector<8x128xi1>
    %35 = arith.andi %31, %34 : vector<8x128xi1>
    %36 = arith.extui %35 : vector<8x128xi1> to vector<8x128xi32>
    %37 = arith.sitofp %36 : vector<8x128xi32> to vector<8x128xf32>
    %38 = arith.addf %28, %37 : vector<8x128xf32>
    %39 = vector.extract_strided_slice %3 {offsets = [0, 3], sizes = [8, 1], strides = [1, 1]} : vector<8x16xi32> to vector<8x1xi32>
    %40 = vector.broadcast %39 : vector<8x1xi32> to vector<8x128xi32>
    %41 = arith.cmpi eq, %40, %7 : vector<8x128xi32>
    %c0_i32_5 = arith.constant 0 : i32
    %42 = vector.broadcast %c0_i32_5 : i32 to vector<8x1xi32>
    %43 = arith.cmpi ne, %39, %42 : vector<8x1xi32>
    %44 = vector.broadcast %43 : vector<8x1xi1> to vector<8x128xi1>
    %45 = arith.andi %41, %44 : vector<8x128xi1>
    %46 = arith.extui %45 : vector<8x128xi1> to vector<8x128xi32>
    %47 = arith.sitofp %46 : vector<8x128xi32> to vector<8x128xf32>
    %48 = arith.addf %38, %47 : vector<8x128xf32>
    %49 = vector.extract_strided_slice %3 {offsets = [0, 4], sizes = [8, 1], strides = [1, 1]} : vector<8x16xi32> to vector<8x1xi32>
    %50 = vector.broadcast %49 : vector<8x1xi32> to vector<8x128xi32>
    %51 = arith.cmpi eq, %50, %7 : vector<8x128xi32>
    %c0_i32_6 = arith.constant 0 : i32
    %52 = vector.broadcast %c0_i32_6 : i32 to vector<8x1xi32>
    %53 = arith.cmpi ne, %49, %52 : vector<8x1xi32>
    %54 = vector.broadcast %53 : vector<8x1xi1> to vector<8x128xi1>
    %55 = arith.andi %51, %54 : vector<8x128xi1>
    %56 = arith.extui %55 : vector<8x128xi1> to vector<8x128xi32>
    %57 = arith.sitofp %56 : vector<8x128xi32> to vector<8x128xf32>
    %58 = arith.addf %48, %57 : vector<8x128xf32>
    %59 = vector.extract_strided_slice %3 {offsets = [0, 5], sizes = [8, 1], strides = [1, 1]} : vector<8x16xi32> to vector<8x1xi32>
    %60 = vector.broadcast %59 : vector<8x1xi32> to vector<8x128xi32>
    %61 = arith.cmpi eq, %60, %7 : vector<8x128xi32>
    %c0_i32_7 = arith.constant 0 : i32
    %62 = vector.broadcast %c0_i32_7 : i32 to vector<8x1xi32>
    %63 = arith.cmpi ne, %59, %62 : vector<8x1xi32>
    %64 = vector.broadcast %63 : vector<8x1xi1> to vector<8x128xi1>
    %65 = arith.andi %61, %64 : vector<8x128xi1>
    %66 = arith.extui %65 : vector<8x128xi1> to vector<8x128xi32>
    %67 = arith.sitofp %66 : vector<8x128xi32> to vector<8x128xf32>
    %68 = arith.addf %58, %67 : vector<8x128xf32>
    %69 = vector.extract_strided_slice %3 {offsets = [0, 6], sizes = [8, 1], strides = [1, 1]} : vector<8x16xi32> to vector<8x1xi32>
    %70 = vector.broadcast %69 : vector<8x1xi32> to vector<8x128xi32>
    %71 = arith.cmpi eq, %70, %7 : vector<8x128xi32>
    %c0_i32_8 = arith.constant 0 : i32
    %72 = vector.broadcast %c0_i32_8 : i32 to vector<8x1xi32>
    %73 = arith.cmpi ne, %69, %72 : vector<8x1xi32>
    %74 = vector.broadcast %73 : vector<8x1xi1> to vector<8x128xi1>
    %75 = arith.andi %71, %74 : vector<8x128xi1>
    %76 = arith.extui %75 : vector<8x128xi1> to vector<8x128xi32>
    %77 = arith.sitofp %76 : vector<8x128xi32> to vector<8x128xf32>
    %78 = arith.addf %68, %77 : vector<8x128xf32>
    %79 = vector.extract_strided_slice %3 {offsets = [0, 7], sizes = [8, 1], strides = [1, 1]} : vector<8x16xi32> to vector<8x1xi32>
    %80 = vector.broadcast %79 : vector<8x1xi32> to vector<8x128xi32>
    %81 = arith.cmpi eq, %80, %7 : vector<8x128xi32>
    %c0_i32_9 = arith.constant 0 : i32
    %82 = vector.broadcast %c0_i32_9 : i32 to vector<8x1xi32>
    %83 = arith.cmpi ne, %79, %82 : vector<8x1xi32>
    %84 = vector.broadcast %83 : vector<8x1xi1> to vector<8x128xi1>
    %85 = arith.andi %81, %84 : vector<8x128xi1>
    %86 = arith.extui %85 : vector<8x128xi1> to vector<8x128xi32>
    %87 = arith.sitofp %86 : vector<8x128xi32> to vector<8x128xf32>
    %88 = arith.addf %78, %87 : vector<8x128xf32>
    %89 = vector.extract_strided_slice %3 {offsets = [0, 8], sizes = [8, 1], strides = [1, 1]} : vector<8x16xi32> to vector<8x1xi32>
    %90 = vector.broadcast %89 : vector<8x1xi32> to vector<8x128xi32>
    %91 = arith.cmpi eq, %90, %7 : vector<8x128xi32>
    %c0_i32_10 = arith.constant 0 : i32
    %92 = vector.broadcast %c0_i32_10 : i32 to vector<8x1xi32>
    %93 = arith.cmpi ne, %89, %92 : vector<8x1xi32>
    %94 = vector.broadcast %93 : vector<8x1xi1> to vector<8x128xi1>
    %95 = arith.andi %91, %94 : vector<8x128xi1>
    %96 = arith.extui %95 : vector<8x128xi1> to vector<8x128xi32>
    %97 = arith.sitofp %96 : vector<8x128xi32> to vector<8x128xf32>
    %98 = arith.addf %88, %97 : vector<8x128xf32>
    %99 = vector.extract_strided_slice %3 {offsets = [0, 9], sizes = [8, 1], strides = [1, 1]} : vector<8x16xi32> to vector<8x1xi32>
    %100 = vector.broadcast %99 : vector<8x1xi32> to vector<8x128xi32>
    %101 = arith.cmpi eq, %100, %7 : vector<8x128xi32>
    %c0_i32_11 = arith.constant 0 : i32
    %102 = vector.broadcast %c0_i32_11 : i32 to vector<8x1xi32>
    %103 = arith.cmpi ne, %99, %102 : vector<8x1xi32>
    %104 = vector.broadcast %103 : vector<8x1xi1> to vector<8x128xi1>
    %105 = arith.andi %101, %104 : vector<8x128xi1>
    %106 = arith.extui %105 : vector<8x128xi1> to vector<8x128xi32>
    %107 = arith.sitofp %106 : vector<8x128xi32> to vector<8x128xf32>
    %108 = arith.addf %98, %107 : vector<8x128xf32>
    %109 = vector.extract_strided_slice %3 {offsets = [0, 10], sizes = [8, 1], strides = [1, 1]} : vector<8x16xi32> to vector<8x1xi32>
    %110 = vector.broadcast %109 : vector<8x1xi32> to vector<8x128xi32>
    %111 = arith.cmpi eq, %110, %7 : vector<8x128xi32>
    %c0_i32_12 = arith.constant 0 : i32
    %112 = vector.broadcast %c0_i32_12 : i32 to vector<8x1xi32>
    %113 = arith.cmpi ne, %109, %112 : vector<8x1xi32>
    %114 = vector.broadcast %113 : vector<8x1xi1> to vector<8x128xi1>
    %115 = arith.andi %111, %114 : vector<8x128xi1>
    %116 = arith.extui %115 : vector<8x128xi1> to vector<8x128xi32>
    %117 = arith.sitofp %116 : vector<8x128xi32> to vector<8x128xf32>
    %118 = arith.addf %108, %117 : vector<8x128xf32>
    %119 = vector.extract_strided_slice %3 {offsets = [0, 11], sizes = [8, 1], strides = [1, 1]} : vector<8x16xi32> to vector<8x1xi32>
    %120 = vector.broadcast %119 : vector<8x1xi32> to vector<8x128xi32>
    %121 = arith.cmpi eq, %120, %7 : vector<8x128xi32>
    %c0_i32_13 = arith.constant 0 : i32
    %122 = vector.broadcast %c0_i32_13 : i32 to vector<8x1xi32>
    %123 = arith.cmpi ne, %119, %122 : vector<8x1xi32>
    %124 = vector.broadcast %123 : vector<8x1xi1> to vector<8x128xi1>
    %125 = arith.andi %121, %124 : vector<8x128xi1>
    %126 = arith.extui %125 : vector<8x128xi1> to vector<8x128xi32>
    %127 = arith.sitofp %126 : vector<8x128xi32> to vector<8x128xf32>
    %128 = arith.addf %118, %127 : vector<8x128xf32>
    %129 = vector.extract_strided_slice %3 {offsets = [0, 12], sizes = [8, 1], strides = [1, 1]} : vector<8x16xi32> to vector<8x1xi32>
    %130 = vector.broadcast %129 : vector<8x1xi32> to vector<8x128xi32>
    %131 = arith.cmpi eq, %130, %7 : vector<8x128xi32>
    %c0_i32_14 = arith.constant 0 : i32
    %132 = vector.broadcast %c0_i32_14 : i32 to vector<8x1xi32>
    %133 = arith.cmpi ne, %129, %132 : vector<8x1xi32>
    %134 = vector.broadcast %133 : vector<8x1xi1> to vector<8x128xi1>
    %135 = arith.andi %131, %134 : vector<8x128xi1>
    %136 = arith.extui %135 : vector<8x128xi1> to vector<8x128xi32>
    %137 = arith.sitofp %136 : vector<8x128xi32> to vector<8x128xf32>
    %138 = arith.addf %128, %137 : vector<8x128xf32>
    %139 = vector.extract_strided_slice %3 {offsets = [0, 13], sizes = [8, 1], strides = [1, 1]} : vector<8x16xi32> to vector<8x1xi32>
    %140 = vector.broadcast %139 : vector<8x1xi32> to vector<8x128xi32>
    %141 = arith.cmpi eq, %140, %7 : vector<8x128xi32>
    %c0_i32_15 = arith.constant 0 : i32
    %142 = vector.broadcast %c0_i32_15 : i32 to vector<8x1xi32>
    %143 = arith.cmpi ne, %139, %142 : vector<8x1xi32>
    %144 = vector.broadcast %143 : vector<8x1xi1> to vector<8x128xi1>
    %145 = arith.andi %141, %144 : vector<8x128xi1>
    %146 = arith.extui %145 : vector<8x128xi1> to vector<8x128xi32>
    %147 = arith.sitofp %146 : vector<8x128xi32> to vector<8x128xf32>
    %148 = arith.addf %138, %147 : vector<8x128xf32>
    %149 = vector.extract_strided_slice %3 {offsets = [0, 14], sizes = [8, 1], strides = [1, 1]} : vector<8x16xi32> to vector<8x1xi32>
    %150 = vector.broadcast %149 : vector<8x1xi32> to vector<8x128xi32>
    %151 = arith.cmpi eq, %150, %7 : vector<8x128xi32>
    %c0_i32_16 = arith.constant 0 : i32
    %152 = vector.broadcast %c0_i32_16 : i32 to vector<8x1xi32>
    %153 = arith.cmpi ne, %149, %152 : vector<8x1xi32>
    %154 = vector.broadcast %153 : vector<8x1xi1> to vector<8x128xi1>
    %155 = arith.andi %151, %154 : vector<8x128xi1>
    %156 = arith.extui %155 : vector<8x128xi1> to vector<8x128xi32>
    %157 = arith.sitofp %156 : vector<8x128xi32> to vector<8x128xf32>
    %158 = arith.addf %148, %157 : vector<8x128xf32>
    %159 = vector.extract_strided_slice %3 {offsets = [0, 15], sizes = [8, 1], strides = [1, 1]} : vector<8x16xi32> to vector<8x1xi32>
    %160 = vector.broadcast %159 : vector<8x1xi32> to vector<8x128xi32>
    %161 = arith.cmpi eq, %160, %7 : vector<8x128xi32>
    %c0_i32_17 = arith.constant 0 : i32
    %162 = vector.broadcast %c0_i32_17 : i32 to vector<8x1xi32>
    %163 = arith.cmpi ne, %159, %162 : vector<8x1xi32>
    %164 = vector.broadcast %163 : vector<8x1xi1> to vector<8x128xi1>
    %165 = arith.andi %161, %164 : vector<8x128xi1>
    %166 = arith.extui %165 : vector<8x128xi1> to vector<8x128xi32>
    %167 = arith.sitofp %166 : vector<8x128xi32> to vector<8x128xf32>
    %168 = arith.addf %158, %167 : vector<8x128xf32>
    %c0_18 = arith.constant 0 : index
    %c0_19 = arith.constant 0 : index
    %169 = vector.load %arg9[%c0_18, %c0_19] : memref<8x128xf32, #tpu.memory_space<vmem>>, vector<8x128xf32>
    %c0_20 = arith.constant 0 : index
    %c0_21 = arith.constant 0 : index
    %170 = vector.load %arg3[%c0_20, %c0_21] : memref<128x128xf32, #tpu.memory_space<vmem>>, vector<128x128xf32>
    %cst_22 = arith.constant dense<0.000000e+00> : vector<8x128xf32>
    %171 = tpu.matmul %168, %170, %cst_22 {dimension_numbers = #tpu.dot_dimension_numbers<[1], [0], [0], [1], [0, 0, 1, 1], [], []>} : vector<8x128xf32>, vector<128x128xf32>, vector<8x128xf32> -> vector<8x128xf32>
    %172 = arith.addf %169, %171 : vector<8x128xf32>
    %c0_23 = arith.constant 0 : index
    %c0_24 = arith.constant 0 : index
    %173 = vector.load %arg9[%c0_23, %c0_24] : memref<8x128xf32, #tpu.memory_space<vmem>>, vector<8x128xf32>
    tpu.vector_store %arg9[%c0_23, %c0_24], %172 {strides = array<i32>} : memref<8x128xf32, #tpu.memory_space<vmem>>, vector<8x128xf32>,
    %c0_i32_25 = arith.constant 0 : i32
    %174 = arith.cmpi eq, %arg1, %c0_i32_25 : i32
    %175 = arith.extui %174 : i1 to i32
    %c0_i32_26 = arith.constant 0 : i32
    %176 = arith.cmpi ne, %175, %c0_i32_26 : i32
    scf.if %176 {
      %c0_i32_27 = arith.constant 0 : i32
      %177 = vector.broadcast %c0_i32_27 : i32 to vector<8x16xi32>
      %178 = arith.cmpi ne, %3, %177 : vector<8x16xi32>
      %179 = arith.extui %178 : vector<8x16xi1> to vector<8x16xi32>
      %180 = arith.sitofp %179 : vector<8x16xi32> to vector<8x16xf32>
      %cst_28 = arith.constant dense<0.000000e+00> : vector<8xf32>
      %181 = vector.multi_reduction <add>, %180, %cst_28 [1] : vector<8x16xf32> to vector<8xf32>
      %182 = vector.shape_cast %181 : vector<8xf32> to vector<8x1xf32>
      %cst_29 = arith.constant 9.99999982E-14 : f32
      %183 = vector.broadcast %cst_29 : f32 to vector<8x1xf32>
      %184 = arith.maximumf %182, %183 : vector<8x1xf32>
      %185 = tpu.reciprocal %184 : vector<8x1xf32> -> vector<8x1xf32>
      %c0_30 = arith.constant 0 : index
      %c0_31 = arith.constant 0 : index
      %186 = vector.load %arg9[%c0_30, %c0_31] : memref<8x128xf32, #tpu.memory_space<vmem>>, vector<8x128xf32>
      %187 = vector.broadcast %185 : vector<8x1xf32> to vector<8x128xf32>
      %188 = arith.mulf %186, %187 : vector<8x128xf32>
      %c0_32 = arith.constant 0 : index
      %c0_33 = arith.constant 0 : index
      %189 = vector.load %arg4[%c0_32, %c0_33] : memref<128x128xf32, #tpu.memory_space<vmem>>, vector<128x128xf32>
      %cst_34 = arith.constant dense<0.000000e+00> : vector<8x128xf32>
      %190 = tpu.matmul %188, %189, %cst_34 {dimension_numbers = #tpu.dot_dimension_numbers<[1], [0], [0], [1], [0, 0, 1, 1], [], []>} : vector<8x128xf32>, vector<128x128xf32>, vector<8x128xf32> -> vector<8x128xf32>
      %c0_35 = arith.constant 0 : index
      %c0_36 = arith.constant 0 : index
      %191 = vector.load %arg5[%c0_35, %c0_36] : memref<1x128xf32, #tpu.memory_space<vmem>>, vector<1x128xf32>
      %192 = vector.broadcast %191 : vector<1x128xf32> to vector<8x128xf32>
      %193 = arith.addf %190, %192 : vector<8x128xf32>
      %cst_37 = arith.constant 0.000000e+00 : f32
      %194 = vector.broadcast %cst_37 : f32 to vector<8x128xf32>
      %195 = arith.maximumf %193, %194 : vector<8x128xf32>
      %c0_38 = arith.constant 0 : index
      %c0_39 = arith.constant 0 : index
      %196 = vector.load %arg6[%c0_38, %c0_39] : memref<128x128xf32, #tpu.memory_space<vmem>>, vector<128x128xf32>
      %cst_40 = arith.constant dense<0.000000e+00> : vector<8x128xf32>
      %197 = tpu.matmul %195, %196, %cst_40 {dimension_numbers = #tpu.dot_dimension_numbers<[1], [0], [0], [1], [0, 0, 1, 1], [], []>} : vector<8x128xf32>, vector<128x128xf32>, vector<8x128xf32> -> vector<8x128xf32>
      %c0_41 = arith.constant 0 : index
      %c0_42 = arith.constant 0 : index
      %198 = vector.load %arg7[%c0_41, %c0_42] : memref<1x128xf32, #tpu.memory_space<vmem>>, vector<1x128xf32>
      %199 = vector.broadcast %198 : vector<1x128xf32> to vector<8x128xf32>
      %200 = arith.addf %197, %199 : vector<8x128xf32>
      %c0_43 = arith.constant 0 : index
      %c0_44 = arith.constant 0 : index
      %201 = vector.load %arg8[%c0_43, %c0_44] : memref<8x128xf32, #tpu.memory_space<vmem>>, vector<8x128xf32>
      tpu.vector_store %arg8[%c0_43, %c0_44], %200 {strides = array<i32>} : memref<8x128xf32, #tpu.memory_space<vmem>>, vector<8x128xf32>,
    } else {
    }
    return
  }
  func.func @transform_0(%arg0: i32, %arg1: i32) -> (i32, i32) {
    %c0_i32 = arith.constant 0 : i32
    %c0_i32_0 = arith.constant 0 : i32
    return %arg0, %c0_i32 : i32, i32
  }
  func.func @transform_1(%arg0: i32, %arg1: i32) -> (i32, i32) {
    %c0_i32 = arith.constant 0 : i32
    %c0_i32_0 = arith.constant 0 : i32
    return %arg1, %c0_i32 : i32, i32
  }
  func.func @transform_2(%arg0: i32, %arg1: i32) -> (i32, i32) {
    %c0_i32 = arith.constant 0 : i32
    %c0_i32_0 = arith.constant 0 : i32
    %c0_i32_1 = arith.constant 0 : i32
    return %c0_i32, %c0_i32_0 : i32, i32
  }
  func.func @transform_3(%arg0: i32, %arg1: i32) -> (i32, i32) {
    %c0_i32 = arith.constant 0 : i32
    %c0_i32_0 = arith.constant 0 : i32
    %c0_i32_1 = arith.constant 0 : i32
    return %c0_i32, %c0_i32_0 : i32, i32
  }
  func.func @transform_4(%arg0: i32, %arg1: i32) -> (i32, i32) {
    %c0_i32 = arith.constant 0 : i32
    %c0_i32_0 = arith.constant 0 : i32
    %c0_i32_1 = arith.constant 0 : i32
    return %c0_i32, %c0_i32_0 : i32, i32
  }
  func.func @transform_5(%arg0: i32, %arg1: i32) -> (i32, i32) {
    %c0_i32 = arith.constant 0 : i32
    %c0_i32_0 = arith.constant 0 : i32
    %c0_i32_1 = arith.constant 0 : i32
    return %c0_i32, %c0_i32_0 : i32, i32
  }
  func.func @transform_6(%arg0: i32, %arg1: i32) -> (i32, i32) {
    %c0_i32 = arith.constant 0 : i32
    %c0_i32_0 = arith.constant 0 : i32
    return %arg0, %c0_i32 : i32, i32
  }
}

</mosaic_0001>

<bundles_post_ra>
// kernel: tpu_custom_call.1
= control target key start
LH: loop header
LB: loop body
LE: loop exit
PB: predicated region body
PF: predicated region fallthrough
CT: control target
= control target key end

     0   :  { %s1561_s0 = inlined_call_operand.hbm [shape: s32[16,16], index: 0, kind: input, shape index: {}]   ;;  %s1562_s1 = inlined_call_operand.hbm [shape: f32[128,128], index: 1, kind: input, shape index: {}]   ;;  %s1563_s2 = inlined_call_operand.hbm [shape: f32[128,128], index: 2, kind: input, shape index: {}]   ;;  %s1564_s3 = inlined_call_operand.vmem [shape: f32[1,128], index: 3, kind: input, shape index: {}]   ;;  %s1565_s4 = inlined_call_operand.hbm [shape: f32[128,128], index: 4, kind: input, shape index: {}]   ;;  %s1566_s5 = inlined_call_operand.vmem [shape: f32[1,128], index: 5, kind: input, shape index: {}]   ;;  %s1567_s6 = inlined_call_operand.hbm [shape: f32[16,128], index: 6, kind: output, shape index: {}]  }
   0x1   :  { %1568 = sst [smem:[#allocation16_spill]] %s1562_s1 }
   0x2   :  { %11 = vsyncpa [#allocation4], 0 }
   0x3   :  { %13 = vsyncpa [#allocation4 + $0x1], 0 }
   0x4   :  { %14 = vsyncpa [#allocation7], 0 }
   0x5   :  { %15 = vsyncpa [#allocation10], 0 }
   0x6   :  { %16 = vsyncpa [#allocation5], 0 }
   0x7   :  { %18 = vsyncpa [#allocation5 + $0x1], 0  ;;  %s1266_s21 = smov 0   ;;  %s1268_s22 = smov 0  }
   0x8   :  { %s1270_s23 = smov 0   ;;  %s1272_s24 = smov 0  }
   0x9   :  { %s1274_s25 = smov 0   ;;  %s1276_s26 = smov 0  }
   0xa LB: > { %s816_s27 = sadd.s32 4294967295, %s1207_s26   ;;  %p818_p0 = scmp.ge.s32.totalorder %s1207_s26, 1  ;;  %s1207_s26 = sphi %s1276_s26, %s24_s26   ;;  %s1203_s25 = sphi %s1274_s25, %s1581_s25   ;;  %s1199_s24 = sphi %s1272_s24, %s1580_s24   ;;  %s1195_s23 = sphi %s1270_s23, %s1579_s23   ;;  %s1191_s22 = sphi %s1268_s22, %s1578_s22   ;;  %s1187_s21 = sphi %s1266_s21, %s1577_s21  }
   0xb   : > { %p1300_p1 = scmp.eq.s32.totalorder %s816_s27, 0  ;;  %p203_p2 = scmp.lt.s32.totalorder %s1207_s26, 3 }
   0xc   : > { %s1570_s1 = sld [smem:[#allocation16_spill]]  ;;  %s1209_s9 = smov [#allocation6]  }
   0xd   : > { %p1308_p3 = pnand %p818_p0, %p203_p2  ;;  %s219_s10 = sshll.u32 %s1209_s9, 4  ;;  %s220_s10 = int_to_ptr.vmem [resolvable:$true] %s219_s10 }
   0xe   : > { %p822_p6 = scmp.ge.s32.totalorder %s1207_s26, 2  ;;  %s231_s14 = sshll.u32 %s1563_s2, 4  ;;  %s232_s14 = int_to_ptr.hbm [resolvable:$true] %s231_s14 }
   0xf   : > { %p868_p4 = pneg %p1308_p3  ;;  %s1210_s15 = smov 128  }
  0x10   : > { %s1211_s16 = smov 8   ;;  %s1212_s17 = smov [#allocation8]  }
  0x11   : > { %p1316_p5 = pnand %p868_p4, %p1300_p1  ;;  %s233_s18 = sshll.u32 %s1212_s17, 4  ;;  %s234_s18 = int_to_ptr.vmem [resolvable:$true] %s233_s18 }
  0x12   : > { %s217_s7 = sshll.u32 %s1570_s1, 4  ;;  %s248_s29 = sshll.u32 %s1565_s4, 4  ;;  %s218_s7 = int_to_ptr.hbm [resolvable:$true] %s217_s7  ;;  %s249_s29 = int_to_ptr.hbm [resolvable:$true] %s248_s29 }
  0x13   : > { %871 = dma.hbm_to_vmem [thread:$0]  (!%p1316_p5), %s218_s7, 2048, %s220_s10, [#allocation7], %s1210_s15, %s1210_s15, %s1211_s16  }
  0x14   : > { %874 = dma.hbm_to_vmem [thread:$0]  (!%p1316_p5), %s232_s14, 2048, %s234_s18, [#allocation7], %s1210_s15, %s1210_s15, %s1211_s16  }
  0x15   : > { %s1213_s30 = smov [#allocation9]   ;;  %s817_s7 = sadd.s32 4294967294, %s1207_s26  }
  0x16   : > { %s250_s9 = sshll.u32 %s1213_s30, 4  ;;  %s36_s10 = sadd.s32 1, %s1203_s25  ;;  %s251_s9 = int_to_ptr.vmem [resolvable:$true] %s250_s9 }
  0x17   : > { %877 = dma.hbm_to_vmem [thread:$0]  (!%p1316_p5), %s249_s29, 2048, %s251_s9, [#allocation10], %s1210_s15, %s1210_s15, %s1211_s16  }
  0x18   : > { %s43_s12 = sadd.s32 1, %s1195_s23  ;;  %p38_p7 = scmp.ge.s32.totalorder %s36_s10, 2 }
  0x19   : > { %p50_p8 = scmp.ne.s32.totalorder %s1195_s23, %s1191_s22  ;;  %p51_p9 = scmp.eq.s32.totalorder %s1207_s26, 0 }
  0x1a   : > { %p56_p10 = scmp.ne.s32.totalorder %s1191_s22, %s1187_s21  ;;  %s1583_s10 = smov (%p38_p7, %s36_s10), 0 }
  0x1b   : > { %p1343_p11 = por %p51_p9, %p50_p8  ;;  %s40_s14 = ssub.s32 %s1203_s25, %s1583_s10 }
  0x1c   : > { %p1349_p12 = por %p1300_p1, %p56_p10  ;;  %p190_p13 = scmp.eq.s32.totalorder %s816_s27, 1 }
  0x1d   : > { %p41_p0 = scmp.eq.s32.totalorder %s40_s14, 0  ;;  %p196_p2 = scmp.eq.s32.totalorder %s817_s7, 1 }
  0x1e   : > { %p1357_p4 = por %p190_p13, %p50_p8  ;;  %p889_p5 = scmp.lt.s32.totalorder %s1207_s26, 2 }
  0x1f   : > { %s1363_s16 = scalar_select %p41_p0, %s1195_s23, %s43_s12  }
  0x20   : > { %p1365_p7 = por %p196_p2, %p56_p10  ;;  %s267_s18 = sand.u32 1, %s1195_s23  }
  0x21   : > { %s823_s19 = sshll.u32 %s267_s18, 3  ;;  %s824_s20 = sshll.u32 %s1203_s25, 3 }
  0x22   : > { %s275_s27 = scalar_lea.hbm %s1561_s0, %s824_s20  ;;  %s271_s9 = scalar_lea.vmem [#allocation3], %s823_s19 }
  0x23   : > { %s279_s7 = sshll.u32 %s271_s9, 4  ;;  %s277_s14 = sshll.u32 %s275_s27, 4  ;;  %s280_s7 = int_to_ptr.vmem [resolvable:$true] %s279_s7  ;;  %s278_s14 = int_to_ptr.hbm [resolvable:$true] %s277_s14 }
  0x24   : > { %p879_p8 = pnand %p889_p5, %p1343_p11  ;;  %s268_s12 = scalar_lea.sflag [#allocation4], %s267_s18 }
  0x25   : > { %288 = sbr.rel (%p1308_p3) target bundleno = 664 (0x298), region = 44  ;;  %s1379_s1 = sand.u32 (!%p1308_p3), 1, %s1191_s22  }
  0x26   : > { %881 = dma.hbm_to_vmem [thread:$0]  (!%p879_p8), %s278_s14, 128, %s280_s7, %s268_s12  }
  0x27   : > { %s826_s20 = sshll.u32 (!%p1308_p3), %s1379_s1, 3  ;;  %s291_s19 = scalar_lea.sflag (!%p1308_p3), [#allocation4], %s1379_s1 }
  0x28   : > { %s294_s29 = scalar_lea.vmem (!%p1308_p3), [#allocation3], %s826_s20 }
  0x2a   : > { %1170 = dma.done.wait (%p1349_p12), %s291_s19, 128  }
  0x2b   : > { %1172 = vsyncadd (%p1349_p12), %s291_s19, 4294967168 }
  0x2c   : > { %1174 = dma.done.wait (%p1300_p1), [#allocation7], 4096  }
  0x2d   : > { %1176 = vsyncadd (%p1300_p1), [#allocation7], 4294963200 }
  0x2e   : > { %1178 = dma.done.wait (%p1300_p1), [#allocation10], 2048  }
  0x2f   : > { %1180 = vsyncadd (%p1300_p1), [#allocation10], 4294965248  ;;  %v1214_v0 = vmov 1   ;;  %v1215_v1 = vmov 0   ;;  %v1216_v2 = vmov 2   ;;  %v1397_v3 = vld [vmem:[%s294_s29] sm:$0xff]  ;;  %v347_v45 = vlaneseq }
  0x30   : > { %965 = vset.pattern.permute.xlu1 %v1214_v0  ;;  %964 = vset.pattern.permute.xlu0 %v1215_v1  ;;  %vm355_vm0 = vcmp.ne.s32.totalorder %v1397_v3, 0  ;;  %v1217_v5 = vmov 3   ;;  %v1218_v6 = vmov 4   ;;  %v1219_v7 = vmov 5   ;;  %v561_v31 = vld [vmem:[#allocation6 + $0x78] sm:$0xff]  ;;  %v560_v32 = vld [vmem:[#allocation6 + $0x70] sm:$0xff] }
  0x31   : > { %966 = vset.pattern.permute.xlu2 %v1216_v2  ;;  %366 = vperm.xlu1 %965, %v1397_v3   ;;  %v1405_v4 = vsel %vm355_vm0, 1, %v1215_v1  ;;  %v1220_v8 = vmov 6   ;;  %v1221_v9 = vmov 8   ;;  %v1222_v10 = vmov 7   ;;  %v559_v35 = vld [vmem:[#allocation6 + $0x68] sm:$0xff]  ;;  %v558_v36 = vld [vmem:[#allocation6 + $0x60] sm:$0xff] }
  0x32   : > { %352 = vperm.xlu0 %964, %v1397_v3   ;;  %378 = vperm.xlu2 %966, %v1397_v3   ;;  %v1223_v11 = vmov 10   ;;  %v1224_v12 = vmov 13   ;;  %v1225_v13 = vmov 9   ;;  %v1226_v14 = vmov 15   ;;  %v557_v37 = vld [vmem:[#allocation6 + $0x58] sm:$0xff]  ;;  %v556_v42 = vld [vmem:[#allocation6 + $0x50] sm:$0xff] }
  0x33   : > { %v1227_v15 = vmov 11   ;;  %v1228_v16 = vmov 12   ;;  %v1229_v17 = vmov 14   ;;  %562 = vmatpush.msra.mxu0 %v561_v31  ;;  %v1230_v38 = vmov 0.0   ;;  %v555_v44 = vld [vmem:[#allocation6 + $0x48] sm:$0xff]  ;;  %v554_v47 = vld [vmem:[#allocation6 + $0x40] sm:$0xff] }
  0x34   : > { %v847_v39 = vsel %vm355_vm0, 1.0, %v1230_v38  ;;  %vm588_vm1 = vcmask 130048   ;;  %v1465_v48 = vand.u32 127, %v347_v45  ;;  %v553_v49 = vld [vmem:[#allocation6 + $0x38] sm:$0xff]  ;;  %v552_v51 = vld [vmem:[#allocation6 + $0x30] sm:$0xff]  ;;  %v551_v52 = vld [vmem:[#allocation6 + $0x28] sm:$0xff] }
  0x35   : > { %563 = vmatpush.msra.mxu0 %v560_v32  ;;  %v589_v41 = vsel %vm588_vm1, %v847_v39, 0.0  ;;  %v550_v54 = vld [vmem:[#allocation6 + $0x20] sm:$0xff]  ;;  %v549_v58 = vld [vmem:[#allocation6 + $0x18] sm:$0xff]  ;;  %v548_v60 = vld [vmem:[#allocation6 + $0x10] sm:$0xff]  ;;  %s849_s13 = sshll.u32 %s1199_s24, 3  ;;  %s338_s7 = scalar_lea.vmem [#allocation11], %s826_s20 }
  0x36   : > { %v547_v61 = vld [vmem:[#allocation6 + $0x8] sm:$0xff]  ;;  %v546_v0 = vld [vmem:[#allocation6] sm:$0xff]  ;;  %v624_v39 = vld [vmem:[#allocation8 + $0x78] sm:$0xff]  ;;  %s702_s30 = scalar_lea.hbm %s1567_s6, %s849_s13  ;;  %s704_s14 = sshll.u32 %s338_s7, 4  ;;  %s705_s14 = int_to_ptr.vmem [resolvable:$true] %s704_s14 }
  0x37   : > { %564 = vmatpush.msra.mxu0 %v559_v35  ;;  %629 = vmatpush.msra.mxu1 %v624_v39  ;;  %v618_v45 = vld [vmem:[#allocation8 + $0x48] sm:$0xff]  ;;  %s706_s12 = sshll.u32 %s702_s30, 4  ;;  %s692_s19 = scalar_lea.sflag [#allocation5], %s1379_s1  ;;  %s707_s12 = int_to_ptr.hbm [resolvable:$true] %s706_s12 }
  0x38   : > { %s1131_s24 = sshra.s32 %s707_s12, 4  ;;  %s1137_s13 = scalar_lea.hbm %s1567_s6, 16  ;;  %s1132_s24 = int_to_ptr.hbm [resolvable:$true] %s1131_s24 }
  0x39   : > { %370 = vperm.xlu1 %965, %v1405_v4   ;;  %565 = vmatpush.msra.mxu0 %v558_v36  ;;  %s1133_s29 = scalar_lea.hbm %s1132_s24, 8  ;;  %p1138_p10 = scmp.lt.s32.totalorder %s1132_s24, %s1567_s6 }
  0x3a   : > { %358 = vperm.xlu0 %964, %v1405_v4   ;;  %382 = vperm.xlu2 %966, %v1405_v4   ;;  %p1134_p1 = scmp.ne.s32.totalorder %s1132_s24, %s1133_s29  ;;  %p1139_p11 = scmp.lt.s32.totalorder %s1137_s13, %s1133_s29 }
  0x3b   : > { %566 = vmatpush.msra.mxu0 %v557_v37 }
  0x3c   : > { %p1135_p3 = pnand %p1134_p1, %p1357_p4  ;;  %p1140_p12 = por %p1139_p11, %p1138_p10 }
  0x3d   : > { %567 = vmatpush.msra.mxu0 %v556_v42  ;;  %v621_v42 = vld [vmem:[#allocation8 + $0x60] sm:$0xff] }
  0x3e   : > { %p1136_p9 = pneg %p1135_p3 }
  0x3f   : > { %568 = vmatpush.msra.mxu0 %v555_v44  ;;  %v619_v44 = vld [vmem:[#allocation8 + $0x50] sm:$0xff] }
  0x40   : > { %p1141_p13 = pnand %p1140_p12, %p1136_p9 }
  0x41   : > { %968 = vset.pattern.permute.xlu1 %v1217_v5  ;;  %569 = vmatpush.msra.mxu0 %v554_v47  ;;  %v616_v47 = vld [vmem:[#allocation8 + $0x38] sm:$0xff] }
  0x42   : > { %967 = vset.pattern.permute.xlu0 %v1217_v5  ;;  %394 = vperm.xlu1 %968, %v1405_v4  }
  0x43   : > { %390 = vperm.xlu0 %967, %v1397_v3   ;;  %969 = vset.pattern.permute.xlu2 %v1218_v6 }
  0x44   : > { %402 = vperm.xlu2 %969, %v1397_v3   ;;  %570 = vmatpush.msra.mxu0 %v553_v49  ;;  %v613_v49 = vld [vmem:[#allocation8 + $0x20] sm:$0xff] }
  0x46   : > { %571 = vmatpush.msra.mxu0 %v552_v51  ;;  %v611_v51 = vld [vmem:[#allocation8 + $0x10] sm:$0xff] }
  0x48   : > { %572 = vmatpush.msra.mxu0 %v551_v52 }
  0x4a   : > { %970 = vset.pattern.permute.xlu1 %v1218_v6  ;;  %573 = vmatpush.msra.mxu0 %v550_v54  ;;  %v610_v54 = vld [vmem:[#allocation8 + $0x8] sm:$0xff] }
  0x4b   : > { %972 = vset.pattern.permute.xlu0 %v1219_v7  ;;  %406 = vperm.xlu1 %970, %v1405_v4  }
  0x4c   : > { %418 = vperm.xlu0 %972, %v1405_v4   ;;  %971 = vset.pattern.permute.xlu2 %v1219_v7 }
  0x4d   : > { %414 = vperm.xlu2 %971, %v1397_v3   ;;  %574 = vmatpush.msra.mxu0 %v549_v58  ;;  %v663_v58 = vld [vmem:[#allocation9 + $0x68] sm:$0xff] }
  0x4f   : > { %575 = vmatpush.msra.mxu0 %v548_v60  ;;  %v661_v60 = vld [vmem:[#allocation9 + $0x58] sm:$0xff] }
  0x51   : > { %576 = vmatpush.msra.mxu0 %v547_v61 }
  0x53   : > { %973 = vset.pattern.permute.xlu1 %v1220_v8  ;;  %577 = vmatpush.msra.mxu0 %v546_v0  ;;  %v659_v0 = vld [vmem:[#allocation9 + $0x48] sm:$0xff] }
  0x54   : > { %977 = vset.pattern.permute.xlu0 %v1221_v9  ;;  %426 = vperm.xlu1 %973, %v1397_v3  }
  0x55   : > { %450 = vperm.xlu0 %977, %v1397_v3   ;;  %974 = vset.pattern.permute.xlu2 %v1220_v8 }
  0x56   : > { %430 = vperm.xlu2 %974, %v1405_v4  }
  0x5c   : > { %975 = vset.pattern.permute.xlu1 %v1222_v10 }
  0x5d   : > { %982 = vset.pattern.permute.xlu0 %v1223_v11  ;;  %438 = vperm.xlu1 %975, %v1397_v3  }
  0x5e   : > { %478 = vperm.xlu0 %982, %v1405_v4   ;;  %976 = vset.pattern.permute.xlu2 %v1222_v10 }
  0x5f   : > { %442 = vperm.xlu2 %976, %v1405_v4  }
  0x65   : > { %978 = vset.pattern.permute.xlu1 %v1221_v9 }
  0x66   : > { %987 = vset.pattern.permute.xlu0 %v1224_v12  ;;  %454 = vperm.xlu1 %978, %v1405_v4  }
  0x67   : > { %510 = vperm.xlu0 %987, %v1397_v3   ;;  %979 = vset.pattern.permute.xlu2 %v1225_v13 }
  0x68   : > { %462 = vperm.xlu2 %979, %v1397_v3  }
  0x6e   : > { %980 = vset.pattern.permute.xlu1 %v1225_v13 }
  0x6f   : > { %466 = vperm.xlu1 %980, %v1405_v4   ;;  %992 = vset.pattern.permute.xlu0 %v1226_v14 }
  0x70   : > { %981 = vset.pattern.permute.xlu2 %v1223_v11  ;;  %538 = vperm.xlu0 %992, %v1405_v4  }
  0x71   : > { %474 = vperm.xlu2 %981, %v1397_v3  }
  0x77   : > { %983 = vset.pattern.permute.xlu1 %v1227_v15 }
  0x78   : > { %486 = vperm.xlu1 %983, %v1397_v3  }
  0x79   : > { %984 = vset.pattern.permute.xlu2 %v1227_v15 }
  0x7a   : > { %490 = vperm.xlu2 %984, %v1405_v4  }
  0x80   : > { %985 = vset.pattern.permute.xlu1 %v1228_v16 }
  0x81   : > { %498 = vperm.xlu1 %985, %v1397_v3  }
  0x82   : > { %986 = vset.pattern.permute.xlu2 %v1228_v16 }
  0x83   : > { %502 = vperm.xlu2 %986, %v1405_v4  }
  0x89   : > { %988 = vset.pattern.permute.xlu1 %v1224_v12 }
  0x8a   : > { %514 = vperm.xlu1 %988, %v1405_v4  }
  0x8b   : > { %989 = vset.pattern.permute.xlu2 %v1229_v17 }
  0x8c   : > { %522 = vperm.xlu2 %989, %v1397_v3   ;;  %v1436_v18 = vpop.permute.xlu2 %378 }
  0x8d   : > { %vm380_vm8 = vcmp.eq.s32.totalorder %v1436_v18, %v1465_v48 }
  0x92   : > { %990 = vset.pattern.permute.xlu1 %v1229_v17 }
  0x93   : > { %526 = vperm.xlu1 %990, %v1405_v4  }
  0x94   : > { %991 = vset.pattern.permute.xlu2 %v1226_v14  ;;  %v1438_v19 = vpop.permute.xlu2 %382 }
  0x95   : > { %534 = vperm.xlu2 %991, %v1397_v3   ;;  %vm384_vm9 = vcmp.eq.s32.totalorder %v1438_v19, 1 }
  0x96   : > { %vm385_vm12 = vmand %vm380_vm8, %vm384_vm9 }
  0x97   : > { %v833_v1 = vsel %vm385_vm12, 1.0, %v1230_v38 }
  0x9e   : > { %v1440_v21 = vpop.permute.xlu2 %402 }
  0x9f   : > { %vm404_vm15 = vcmp.eq.s32.totalorder %v1440_v21, %v1465_v48 }
  0xa3   : > { %v367_v20 = vpop.permute.xlu1 %366 }
  0xa4   : > { %v353_v27 = vpop.permute.xlu0 %352  ;;  %vm368_vm5 = vcmp.eq.s32.totalorder %v367_v20, %v1465_v48 }
  0xa5   : > { %vm354_vm3 = vcmp.eq.s32.totalorder %v353_v27, %v1465_v48 }
  0xa7   : > { %v1442_v23 = vpop.permute.xlu2 %414 }
  0xa8   : > { %vm416_vm1 = vcmp.eq.s32.totalorder %v1442_v23, %v1465_v48 }
  0xab   : > { %v371_v22 = vpop.permute.xlu1 %370 }
  0xac   : > { %v359_v30 = vpop.permute.xlu0 %358  ;;  %vm372_vm2 = vcmp.eq.s32.totalorder %v371_v22, 1 }
  0xad   : > { %vm360_vm4 = vcmp.eq.s32.totalorder %v359_v30, 1  ;;  %vm373_vm6 = vmand %vm368_vm5, %vm372_vm2 }
  0xae   : > { %vm361_vm7 = vmand %vm354_vm3, %vm360_vm4  ;;  %v832_v56 = vsel %vm373_vm6, 1.0, %v1230_v38 }
  0xaf   : > { %v831_v57 = vsel %vm361_vm7, 1.0, %v1230_v38 }
  0xb0   : > { %v1448_v26 = vpop.permute.xlu2 %430  ;;  %v376_v62 = vadd.f32 %v832_v56, %v831_v57  ;;  %v665_v56 = vld [vmem:[#allocation9 + $0x78] sm:$0xff]  ;;  %v664_v57 = vld [vmem:[#allocation9 + $0x70] sm:$0xff] }
  0xb1   : > { %vm432_vm3 = vcmp.eq.s32.totalorder %v1448_v26, 1  ;;  %670 = vmatpush.msra.mxu2 %v665_v56 }
  0xb2   : > { %v388_v3 = vadd.f32 %v833_v1, %v376_v62  ;;  %v660_v62 = vld [vmem:[#allocation9 + $0x50] sm:$0xff]  ;;  %v658_v1 = vld [vmem:[#allocation9 + $0x40] sm:$0xff] }
  0xb3   : > { %671 = vmatpush.msra.mxu2 %v664_v57 }
  0xb4   : > { %v1444_v24 = vpop.permute.xlu1 %394 }
  0xb5   : > { %v391_v40 = vpop.permute.xlu0 %390  ;;  %vm396_vm10 = vcmp.eq.s32.totalorder %v1444_v24, 1  ;;  %672 = vmatpush.msra.mxu2 %v663_v58 }
  0xb6   : > { %vm392_vm11 = vcmp.eq.s32.totalorder %v391_v40, %v1465_v48  ;;  %v623_v40 = vld [vmem:[#allocation8 + $0x70] sm:$0xff] }
  0xb7   : > { %vm397_vm14 = vmand %vm392_vm11, %vm396_vm10  ;;  %630 = vmatpush.msra.mxu1 %v623_v40 }
  0xb8   : > { %v834_v2 = vsel %vm397_vm14, 1.0, %v1230_v38 }
  0xb9   : > { %v1452_v29 = vpop.permute.xlu2 %442  ;;  %v400_v6 = vadd.f32 %v834_v2, %v388_v3  ;;  %v657_v3 = vld [vmem:[#allocation9 + $0x38] sm:$0xff] }
  0xba   : > { %vm444_vm6 = vcmp.eq.s32.totalorder %v1452_v29, 1 }
  0xbd   : > { %v1446_v25 = vpop.permute.xlu1 %406  ;;  %590 = vadd.xlane.f32.xlu1 %v589_v41  ;;  %v622_v41 = vld [vmem:[#allocation8 + $0x68] sm:$0xff] }
  0xbe   : > { %v419_v50 = vpop.permute.xlu0 %418  ;;  %vm408_vm13 = vcmp.eq.s32.totalorder %v1446_v25, 1  ;;  %631 = vmatpush.msra.mxu1 %v622_v41 }
  0xbf   : > { %vm409_vm0 = vmand %vm404_vm15, %vm408_vm13  ;;  %vm420_vm2 = vcmp.eq.s32.totalorder %v419_v50, 1  ;;  %v612_v50 = vld [vmem:[#allocation8 + $0x18] sm:$0xff] }
  0xc0   : > { %v835_v5 = vsel %vm409_vm0, 1.0, %v1230_v38  ;;  %vm421_vm5 = vmand %vm416_vm1, %vm420_vm2  ;;  %632 = vmatpush.msra.mxu1 %v621_v42 }
  0xc1   : > { %v412_v8 = vadd.f32 %v835_v5, %v400_v6  ;;  %v836_v9 = vsel %vm421_vm5, 1.0, %v1230_v38  ;;  %v655_v6 = vld [vmem:[#allocation9 + $0x28] sm:$0xff] }
  0xc2   : > { %v1456_v34 = vpop.permute.xlu2 %462 }
  0xc3   : > { %v424_v12 = vadd.f32 %v836_v9, %v412_v8  ;;  %vm464_vm14 = vcmp.eq.s32.totalorder %v1456_v34, %v1465_v48 }
  0xc6   : > { %v1450_v28 = vpop.permute.xlu1 %426 }
  0xc7   : > { %v451_v59 = vpop.permute.xlu0 %450  ;;  %vm428_vm4 = vcmp.eq.s32.totalorder %v1450_v28, %v1465_v48 }
  0xc8   : > { %vm433_vm8 = vmand %vm428_vm4, %vm432_vm3  ;;  %vm452_vm10 = vcmp.eq.s32.totalorder %v451_v59, %v1465_v48  ;;  %v662_v59 = vld [vmem:[#allocation9 + $0x60] sm:$0xff] }
  0xc9   : > { %v837_v11 = vsel %vm433_vm8, 1.0, %v1230_v38  ;;  %673 = vmatpush.msra.mxu2 %v662_v59 }
  0xca   : > { %v436_v15 = vadd.f32 %v837_v11, %v424_v12  ;;  %v653_v11 = vld [vmem:[#allocation9 + $0x18] sm:$0xff] }
  0xcb   : > { %v1463_v46 = vpop.permute.xlu2 %474  ;;  %674 = vmatpush.msra.mxu2 %v661_v60 }
  0xcc   : > { %vm476_vm0 = vcmp.eq.s32.totalorder %v1463_v46, %v1465_v48  ;;  %v617_v46 = vld [vmem:[#allocation8 + $0x40] sm:$0xff] }
  0xcd   : > { %675 = vmatpush.msra.mxu2 %v660_v62 }
  0xcf   : > { %v1454_v33 = vpop.permute.xlu1 %438  ;;  %676 = vmatpush.msra.mxu2 %v659_v0 }
  0xd0   : > { %v479_v7 = vpop.permute.xlu0 %478  ;;  %vm440_vm7 = vcmp.eq.s32.totalorder %v1454_v33, %v1465_v48 }
  0xd1   : > { %vm445_vm11 = vmand %vm440_vm7, %vm444_vm6  ;;  %vm480_vm1 = vcmp.eq.s32.totalorder %v479_v7, 1  ;;  %677 = vmatpush.msra.mxu2 %v658_v1  ;;  %v654_v7 = vld [vmem:[#allocation9 + $0x20] sm:$0xff] }
  0xd2   : > { %v838_v14 = vsel %vm445_vm11, 1.0, %v1230_v38  ;;  %vm481_vm4 = vmand %vm476_vm0, %vm480_vm1 }
  0xd3   : > { %v448_v18 = vadd.f32 %v838_v14, %v436_v15  ;;  %v841_v23 = vsel %vm481_vm4, 1.0, %v1230_v38  ;;  %678 = vmatpush.msra.mxu2 %v657_v3 }
  0xd4   : > { %v1469_v55 = vpop.permute.xlu2 %490 }
  0xd5   : > { %vm492_vm2 = vcmp.eq.s32.totalorder %v1469_v55, 1  ;;  %v609_v55 = vld [vmem:[#allocation8] sm:$0xff] }
  0xd8   : > { %v1461_v43 = vpop.permute.xlu1 %454 }
  0xd9   : > { %vm456_vm9 = vcmp.eq.s32.totalorder %v1461_v43, 1  ;;  %v511_v16 = vpop.permute.xlu0 %510  ;;  %v620_v43 = vld [vmem:[#allocation8 + $0x58] sm:$0xff] }
  0xda   : > { %vm457_vm13 = vmand %vm452_vm10, %vm456_vm9  ;;  %vm512_vm9 = vcmp.eq.s32.totalorder %v511_v16, %v1465_v48  ;;  %633 = vmatpush.msra.mxu1 %v620_v43 }
  0xdb   : > { %v839_v17 = vsel %vm457_vm13, 1.0, %v1230_v38 }
  0xdc   : > { %v460_v20 = vadd.f32 %v839_v17, %v448_v18  ;;  %634 = vmatpush.msra.mxu1 %v619_v44  ;;  %v652_v17 = vld [vmem:[#allocation9 + $0x10] sm:$0xff]  ;;  %v651_v18 = vld [vmem:[#allocation9 + $0x8] sm:$0xff] }
  0xdd   : > { %v503_v4 = vpop.permute.xlu2 %502 }
  0xde   : > { %vm504_vm5 = vcmp.eq.s32.totalorder %v503_v4, 1  ;;  %635 = vmatpush.msra.mxu1 %v618_v45  ;;  %v656_v4 = vld [vmem:[#allocation9 + $0x30] sm:$0xff] }
  0xdf   : > { %679 = vmatpush.msra.mxu2 %v656_v4 }
  0xe0   : > { %636 = vmatpush.msra.mxu1 %v617_v46 }
  0xe1   : > { %v467_v53 = vpop.permute.xlu1 %466  ;;  %680 = vmatpush.msra.mxu2 %v655_v6 }
  0xe2   : > { %vm468_vm12 = vcmp.eq.s32.totalorder %v467_v53, 1  ;;  %v539_v25 = vpop.permute.xlu0 %538  ;;  %637 = vmatpush.msra.mxu1 %v616_v47 }
  0xe3   : > { %vm469_vm15 = vmand %vm464_vm14, %vm468_vm12  ;;  %vm540_vm13 = vcmp.eq.s32.totalorder %v539_v25, 1  ;;  %681 = vmatpush.msra.mxu2 %v654_v7 }
  0xe4   : > { %v840_v19 = vsel %vm469_vm15, 1.0, %v1230_v38 }
  0xe5   : > { %v472_v22 = vadd.f32 %v840_v19, %v460_v20  ;;  %682 = vmatpush.msra.mxu2 %v653_v11  ;;  %v650_v19 = vld [vmem:[#allocation9] sm:$0xff]  ;;  %v993_v20 = vld [vmem:[%s1564_s3] ss:$0 sm:$0xff] }
  0xe6   : > { %v523_v13 = vpop.permute.xlu2 %522 }
  0xe7   : > { %v484_v27 = vadd.f32 %v841_v23, %v472_v22  ;;  %vm524_vm15 = vcmp.eq.s32.totalorder %v523_v13, %v1465_v48  ;;  %683 = vmatpush.msra.mxu2 %v652_v17 }
  0xe9   : > { %684 = vmatpush.msra.mxu2 %v651_v18 }
  0xea   : > { %v487_v63 = vpop.permute.xlu1 %486 }
  0xeb   : > { %vm488_vm3 = vcmp.eq.s32.totalorder %v487_v63, %v1465_v48  ;;  %685 = vmatpush.msra.mxu2 %v650_v19 }
  0xec   : > { %vm493_vm7 = vmand %vm488_vm3, %vm492_vm2 }
  0xed   : > { %v842_v26 = vsel %vm493_vm7, 1.0, %v1230_v38 }
  0xee   : > { %v496_v29 = vadd.f32 %v842_v26, %v484_v27 }
  0xef   : > { %v535_v24 = vpop.permute.xlu2 %534 }
  0xf0   : > { %vm536_vm12 = vcmp.eq.s32.totalorder %v535_v24, %v1465_v48  ;;  %v994_v24 = vld [vmem:[%s1566_s5] ss:$0 sm:$0xff] }
  0xf1   : > { %vm541_vm14 = vmand %vm536_vm12, %vm540_vm13 }
  0xf2   : > { %v846_v35 = vsel %vm541_vm14, 1.0, %v1230_v38 }
  0xf3   : > { %v499_v10 = vpop.permute.xlu1 %498 }
  0xf4   : > { %vm500_vm6 = vcmp.eq.s32.totalorder %v499_v10, %v1465_v48  ;;  %v614_v48 = vld [vmem:[#allocation8 + $0x28] sm:$0xff] }
  0xf5   : > { %vm505_vm10 = vmand %vm500_vm6, %vm504_vm5 }
  0xf6   : > { %v843_v28 = vsel %vm505_vm10, 1.0, %v1230_v38 }
  0xf7   : > { %v508_v31 = vadd.f32 %v843_v28, %v496_v29 }
  0xfc   : > { %v515_v21 = vpop.permute.xlu1 %514 }
  0xfd   : > { %vm516_vm8 = vcmp.eq.s32.totalorder %v515_v21, 1 }
  0xfe   : > { %vm517_vm11 = vmand %vm512_vm9, %vm516_vm8 }
  0xff   : > { %v844_v30 = vsel %vm517_vm11, 1.0, %v1230_v38 }
 0x100   : > { %v520_v33 = vadd.f32 %v844_v30, %v508_v31 }
 0x105   : > { %v527_v32 = vpop.permute.xlu1 %526 }
 0x106   : > { %vm528_vm0 = vcmp.eq.s32.totalorder %v527_v32, 1 }
 0x107   : > { %vm529_vm1 = vmand %vm524_vm15, %vm528_vm0 }
 0x108   : > { %v845_v34 = vsel %vm529_vm1, 1.0, %v1230_v38  ;;  %v615_v38 = vld [vmem:[#allocation8 + $0x30] sm:$0xff] }
 0x109   : > { %v532_v36 = vadd.f32 %v845_v34, %v520_v33  ;;  %638 = vmatpush.msra.mxu1 %v615_v38 }
 0x10b   : > { %v544_v37 = vadd.f32 %v846_v35, %v532_v36  ;;  %639 = vmatpush.msra.mxu1 %v614_v48 }
 0x10d   : > { %578 = vmatmul.f32.vlgmr.msra.gmra.mxu0 %v544_v37  ;;  %640 = vmatpush.msra.mxu1 %v613_v49 }
 0x10f   : > { %641 = vmatpush.msra.mxu1 %v612_v50 }
 0x111   : > { %642 = vmatpush.msra.mxu1 %v611_v51 }
 0x113   : > { %643 = vmatpush.msra.mxu1 %v610_v54 }
 0x115   : > { %644 = vmatpush.msra.mxu1 %v609_v55 }
 0x130   : > { %v591_v52 = vpop.xlane.xlu1 %590 }
 0x131   : > { %v592_v53 = vmax.f32 %v591_v52, 1e-13 }
 0x133   : > { %995 = vrcp.f32 %v592_v53  ;;  %vm598_vm2 = vweird.f32 %v592_v53  ;;  %v604_v8 = vand.u32 2147483648, %v592_v53  ;;  %v602_v10 = vand.u32 2147483647, %v592_v53 }
 0x135   : > { %v605_v12 = vor.u32 1.1754944e-38, %v604_v8  ;;  %vm603_vm5 = vcmp.eq.f32.partialorder %v602_v10, 8.507059e+37 }
 0x139   : > { %v996_v61 = vpop.eup %995 }
 0x13a   : > { %v594_v63 = vmul.f32 %v996_v61, %v592_v53  ;;  %vm599_vm3 = vweird.f32 %v996_v61 }
 0x13b   : > { %vm600_vm4 = vmor %vm598_vm2, %vm599_vm3 }
 0x13c   : > { %v595_v2 = vsub.f32 1.0, %v594_v63 }
 0x13e   : > { %v596_v5 = vmul.f32 %v996_v61, %v595_v2 }
 0x140   : > { %v597_v9 = vadd.f32 %v996_v61, %v596_v5 }
 0x142   : > { %v601_v13 = vsel %vm600_vm4, %v996_v61, %v597_v9 }
 0x143   : > { %v606_v15 = vsel %vm603_vm5, %v605_v12, %v601_v13 }
 0x18a   : > { %v579_v14 = vpop.f32.mrf.mxu0 }
 0x18b   : > { %v608_v16 = vmul.f32 %v606_v15, %v579_v14 }
 0x18d   : > { %645 = vmatmul.f32.vlgmr.msra.gmra.mxu1 %v608_v16 }
 0x20a   : > { %v646_v21 = vpop.f32.mrf.mxu1 }
 0x20b   : > { %v647_v22 = vadd.f32 %v993_v20, %v646_v21 }
 0x20d   : > { %v649_v23 = vmax.f32 %v647_v22, 0.0 }
 0x20f   : > { %686 = vmatmul.f32.vlgmr.msra.gmra.mxu2 %v649_v23 }
 0x292   : > { %v687_v25 = vpop.f32.mrf.mxu2 }
 0x293   : > { %v688_v26 = vadd.f32 %v994_v24, %v687_v25 }
 0x295   : > { %690 = vst [vmem:[%s338_s7] sm:$0xff] %v688_v26 }
 0x296   : > { %1144 = shalt.err (!%p1141_p13)
}
 0x297   : > { %866 = dma.vmem_to_hbm [thread:$0]  (%p1357_p4), %s705_s14, 128, %s707_s12, %s692_s19  }
 0x298 PF: > { %s718_s1 = sand.u32 1, %s1187_s21   ;;  %p883_p0 = pnand %p822_p6, %p1365_p7 }
 0x299   : > { %s719_s18 = scalar_lea.sflag [#allocation5], %s718_s1 }
 0x29a   : > { %p884_p2 = pneg %p883_p0 }
 0x29c   : > { %1182 = dma.done.wait (%p884_p2), %s719_s18, 128  }
 0x29d   : > { %1184 = vsyncadd (%p884_p2), %s719_s18, 4294967168  ;;  %s24_s26 = sadd.s32 1, %s1207_s26   ;;  %s1577_s21 = smov %s1191_s22 }
 0x29e   : > { %p21_p5 = scmp.ge.s32.totalorder %s24_s26, 4   ;;  %s1578_s22 = smov %s1195_s23 }
 0x29f   : > { %s1579_s23 = smov %s1363_s16  ;;  %s1580_s24 = smov %s1203_s25 }
 0x2a0   : > { %s1581_s25 = smov %s1583_s10  ;;  %23 = sbr.rel (!%p21_p5) target bundleno = 10 (0xa), region = 110 }
 0x2a5   :  { %725 = vsyncpa [#allocation4], 1 }
 0x2a6   :  { %727 = vsyncpa [#allocation4 + $0x1], 1 }
 0x2a7   :  { %728 = vsyncpa [#allocation7], 1 }
 0x2a8   :  { %729 = vsyncpa [#allocation10], 1 }
 0x2a9   :  { %730 = vsyncpa [#allocation5], 1 }
 0x2aa   :  { %732 = vsyncpa [#allocation5 + $0x1], 1 }

// kernel: tpu_custom_call.1
= control target key start
LH: loop header
LB: loop body
LE: loop exit
PB: predicated region body
PF: predicated region fallthrough
CT: control target
= control target key end

     0   :  { %s1561_s0 = inlined_call_operand.hbm [shape: s32[16,16], index: 0, kind: input, shape index: {}]   ;;  %s1562_s1 = inlined_call_operand.hbm [shape: f32[128,128], index: 1, kind: input, shape index: {}]   ;;  %s1563_s2 = inlined_call_operand.hbm [shape: f32[128,128], index: 2, kind: input, shape index: {}]   ;;  %s1564_s3 = inlined_call_operand.vmem [shape: f32[1,128], index: 3, kind: input, shape index: {}]   ;;  %s1565_s4 = inlined_call_operand.hbm [shape: f32[128,128], index: 4, kind: input, shape index: {}]   ;;  %s1566_s5 = inlined_call_operand.vmem [shape: f32[1,128], index: 5, kind: input, shape index: {}]   ;;  %s1567_s6 = inlined_call_operand.hbm [shape: f32[16,128], index: 6, kind: output, shape index: {}]  }
   0x1   :  { %1568 = sst [smem:[#allocation16_spill]] %s1562_s1 }
   0x2   :  { %11 = vsyncpa [#allocation4], 0 }
   0x3   :  { %13 = vsyncpa [#allocation4 + $0x1], 0 }
   0x4   :  { %14 = vsyncpa [#allocation7], 0 }
   0x5   :  { %15 = vsyncpa [#allocation10], 0 }
   0x6   :  { %16 = vsyncpa [#allocation5], 0 }
   0x7   :  { %18 = vsyncpa [#allocation5 + $0x1], 0  ;;  %s1266_s21 = smov 0   ;;  %s1268_s22 = smov 0  }
   0x8   :  { %s1270_s23 = smov 0   ;;  %s1272_s24 = smov 0  }
   0x9   :  { %s1274_s25 = smov 0   ;;  %s1276_s26 = smov 0  }
   0xa LB: > { %s816_s27 = sadd.s32 4294967295, %s1207_s26   ;;  %p818_p0 = scmp.ge.s32.totalorder %s1207_s26, 1  ;;  %s1207_s26 = sphi %s1276_s26, %s24_s26   ;;  %s1203_s25 = sphi %s1274_s25, %s1581_s25   ;;  %s1199_s24 = sphi %s1272_s24, %s1580_s24   ;;  %s1195_s23 = sphi %s1270_s23, %s1579_s23   ;;  %s1191_s22 = sphi %s1268_s22, %s1578_s22   ;;  %s1187_s21 = sphi %s1266_s21, %s1577_s21  }
   0xb   : > { %p1300_p1 = scmp.eq.s32.totalorder %s816_s27, 0  ;;  %p203_p2 = scmp.lt.s32.totalorder %s1207_s26, 3 }
   0xc   : > { %s1570_s1 = sld [smem:[#allocation16_spill]]  ;;  %s1209_s9 = smov [#allocation6]  }
   0xd   : > { %p1308_p3 = pnand %p818_p0, %p203_p2  ;;  %s219_s10 = sshll.u32 %s1209_s9, 4  ;;  %s220_s10 = int_to_ptr.vmem [resolvable:$true] %s219_s10 }
   0xe   : > { %p822_p6 = scmp.ge.s32.totalorder %s1207_s26, 2  ;;  %s231_s14 = sshll.u32 %s1563_s2, 4  ;;  %s232_s14 = int_to_ptr.hbm [resolvable:$true] %s231_s14 }
   0xf   : > { %p868_p4 = pneg %p1308_p3  ;;  %s1210_s15 = smov 128  }
  0x10   : > { %s1211_s16 = smov 8   ;;  %s1212_s17 = smov [#allocation8]  }
  0x11   : > { %p1316_p5 = pnand %p868_p4, %p1300_p1  ;;  %s233_s18 = sshll.u32 %s1212_s17, 4  ;;  %s234_s18 = int_to_ptr.vmem [resolvable:$true] %s233_s18 }
  0x12   : > { %s217_s7 = sshll.u32 %s1570_s1, 4  ;;  %s248_s29 = sshll.u32 %s1565_s4, 4  ;;  %s218_s7 = int_to_ptr.hbm [resolvable:$true] %s217_s7  ;;  %s249_s29 = int_to_ptr.hbm [resolvable:$true] %s248_s29 }
  0x13   : > { %871 = dma.hbm_to_vmem [thread:$0]  (!%p1316_p5), %s218_s7, 2048, %s220_s10, [#allocation7], %s1210_s15, %s1210_s15, %s1211_s16  }
  0x14   : > { %874 = dma.hbm_to_vmem [thread:$0]  (!%p1316_p5), %s232_s14, 2048, %s234_s18, [#allocation7], %s1210_s15, %s1210_s15, %s1211_s16  }
  0x15   : > { %s1213_s30 = smov [#allocation9]   ;;  %s817_s7 = sadd.s32 4294967294, %s1207_s26  }
  0x16   : > { %s250_s9 = sshll.u32 %s1213_s30, 4  ;;  %s36_s10 = sadd.s32 1, %s1203_s25  ;;  %s251_s9 = int_to_ptr.vmem [resolvable:$true] %s250_s9 }
  0x17   : > { %877 = dma.hbm_to_vmem [thread:$0]  (!%p1316_p5), %s249_s29, 2048, %s251_s9, [#allocation10], %s1210_s15, %s1210_s15, %s1211_s16  }
  0x18   : > { %s43_s12 = sadd.s32 1, %s1195_s23  ;;  %p38_p7 = scmp.ge.s32.totalorder %s36_s10, 2 }
  0x19   : > { %p50_p8 = scmp.ne.s32.totalorder %s1195_s23, %s1191_s22  ;;  %p51_p9 = scmp.eq.s32.totalorder %s1207_s26, 0 }
  0x1a   : > { %p56_p10 = scmp.ne.s32.totalorder %s1191_s22, %s1187_s21  ;;  %s1583_s10 = smov (%p38_p7, %s36_s10), 0 }
  0x1b   : > { %p1343_p11 = por %p51_p9, %p50_p8  ;;  %s40_s14 = ssub.s32 %s1203_s25, %s1583_s10 }
  0x1c   : > { %p1349_p12 = por %p1300_p1, %p56_p10  ;;  %p190_p13 = scmp.eq.s32.totalorder %s816_s27, 1 }
  0x1d   : > { %p41_p0 = scmp.eq.s32.totalorder %s40_s14, 0  ;;  %p196_p2 = scmp.eq.s32.totalorder %s817_s7, 1 }
  0x1e   : > { %p1357_p4 = por %p190_p13, %p50_p8  ;;  %p889_p5 = scmp.lt.s32.totalorder %s1207_s26, 2 }
  0x1f   : > { %s1363_s16 = scalar_select %p41_p0, %s1195_s23, %s43_s12  }
  0x20   : > { %p1365_p7 = por %p196_p2, %p56_p10  ;;  %s267_s18 = sand.u32 1, %s1195_s23  }
  0x21   : > { %s823_s19 = sshll.u32 %s267_s18, 3  ;;  %s824_s20 = sshll.u32 %s1203_s25, 3 }
  0x22   : > { %s275_s27 = scalar_lea.hbm %s1561_s0, %s824_s20  ;;  %s271_s9 = scalar_lea.vmem [#allocation3], %s823_s19 }
  0x23   : > { %s279_s7 = sshll.u32 %s271_s9, 4  ;;  %s277_s14 = sshll.u32 %s275_s27, 4  ;;  %s280_s7 = int_to_ptr.vmem [resolvable:$true] %s279_s7  ;;  %s278_s14 = int_to_ptr.hbm [resolvable:$true] %s277_s14 }
  0x24   : > { %p879_p8 = pnand %p889_p5, %p1343_p11  ;;  %s268_s12 = scalar_lea.sflag [#allocation4], %s267_s18 }
  0x25   : > { %288 = sbr.rel (%p1308_p3) target bundleno = 664 (0x298), region = 44  ;;  %s1379_s1 = sand.u32 (!%p1308_p3), 1, %s1191_s22  }
  0x26   : > { %881 = dma.hbm_to_vmem [thread:$0]  (!%p879_p8), %s278_s14, 128, %s280_s7, %s268_s12  }
  0x27   : > { %s826_s20 = sshll.u32 (!%p1308_p3), %s1379_s1, 3  ;;  %s291_s19 = scalar_lea.sflag (!%p1308_p3), [#allocation4], %s1379_s1 }
  0x28   : > { %s294_s29 = scalar_lea.vmem (!%p1308_p3), [#allocation3], %s826_s20 }
  0x2a   : > { %1170 = dma.done.wait (%p1349_p12), %s291_s19, 128  }
  0x2b   : > { %1172 = vsyncadd (%p1349_p12), %s291_s19, 4294967168 }
  0x2c   : > { %1174 = dma.done.wait (%p1300_p1), [#allocation7], 4096  }
  0x2d   : > { %1176 = vsyncadd (%p1300_p1), [#allocation7], 4294963200 }
  0x2e   : > { %1178 = dma.done.wait (%p1300_p1), [#allocation10], 2048  }
  0x2f   : > { %1180 = vsyncadd (%p1300_p1), [#allocation10], 4294965248  ;;  %v1214_v0 = vmov 1   ;;  %v1215_v1 = vmov 0   ;;  %v1216_v2 = vmov 2   ;;  %v1397_v3 = vld [vmem:[%s294_s29] sm:$0xff]  ;;  %v347_v45 = vlaneseq }
  0x30   : > { %965 = vset.pattern.permute.xlu1 %v1214_v0  ;;  %964 = vset.pattern.permute.xlu0 %v1215_v1  ;;  %vm355_vm0 = vcmp.ne.s32.totalorder %v1397_v3, 0  ;;  %v1217_v5 = vmov 3   ;;  %v1218_v6 = vmov 4   ;;  %v1219_v7 = vmov 5   ;;  %v561_v31 = vld [vmem:[#allocation6 + $0x78] sm:$0xff]  ;;  %v560_v32 = vld [vmem:[#allocation6 + $0x70] sm:$0xff] }
  0x31   : > { %966 = vset.pattern.permute.xlu2 %v1216_v2  ;;  %366 = vperm.xlu1 %965, %v1397_v3   ;;  %v1405_v4 = vsel %vm355_vm0, 1, %v1215_v1  ;;  %v1220_v8 = vmov 6   ;;  %v1221_v9 = vmov 8   ;;  %v1222_v10 = vmov 7   ;;  %v559_v35 = vld [vmem:[#allocation6 + $0x68] sm:$0xff]  ;;  %v558_v36 = vld [vmem:[#allocation6 + $0x60] sm:$0xff] }
  0x32   : > { %352 = vperm.xlu0 %964, %v1397_v3   ;;  %378 = vperm.xlu2 %966, %v1397_v3   ;;  %v1223_v11 = vmov 10   ;;  %v1224_v12 = vmov 13   ;;  %v1225_v13 = vmov 9   ;;  %v1226_v14 = vmov 15   ;;  %v557_v37 = vld [vmem:[#allocation6 + $0x58] sm:$0xff]  ;;  %v556_v42 = vld [vmem:[#allocation6 + $0x50] sm:$0xff] }
  0x33   : > { %v1227_v15 = vmov 11   ;;  %v1228_v16 = vmov 12   ;;  %v1229_v17 = vmov 14   ;;  %562 = vmatpush.msra.mxu0 %v561_v31  ;;  %v1230_v38 = vmov 0.0   ;;  %v555_v44 = vld [vmem:[#allocation6 + $0x48] sm:$0xff]  ;;  %v554_v47 = vld [vmem:[#allocation6 + $0x40] sm:$0xff] }
  0x34   : > { %v847_v39 = vsel %vm355_vm0, 1.0, %v1230_v38  ;;  %vm588_vm1 = vcmask 130048   ;;  %v1465_v48 = vand.u32 127, %v347_v45  ;;  %v553_v49 = vld [vmem:[#allocation6 + $0x38] sm:$0xff]  ;;  %v552_v51 = vld [vmem:[#allocation6 + $0x30] sm:$0xff]  ;;  %v551_v52 = vld [vmem:[#allocation6 + $0x28] sm:$0xff] }
  0x35   : > { %563 = vmatpush.msra.mxu0 %v560_v32  ;;  %v589_v41 = vsel %vm588_vm1, %v847_v39, 0.0  ;;  %v550_v54 = vld [vmem:[#allocation6 + $0x20] sm:$0xff]  ;;  %v549_v58 = vld [vmem:[#allocation6 + $0x18] sm:$0xff]  ;;  %v548_v60 = vld [vmem:[#allocation6 + $0x10] sm:$0xff]  ;;  %s849_s13 = sshll.u32 %s1199_s24, 3  ;;  %s338_s7 = scalar_lea.vmem [#allocation11], %s826_s20 }
  0x36   : > { %v547_v61 = vld [vmem:[#allocation6 + $0x8] sm:$0xff]  ;;  %v546_v0 = vld [vmem:[#allocation6] sm:$0xff]  ;;  %v624_v39 = vld [vmem:[#allocation8 + $0x78] sm:$0xff]  ;;  %s702_s30 = scalar_lea.hbm %s1567_s6, %s849_s13  ;;  %s704_s14 = sshll.u32 %s338_s7, 4  ;;  %s705_s14 = int_to_ptr.vmem [resolvable:$true] %s704_s14 }
  0x37   : > { %564 = vmatpush.msra.mxu0 %v559_v35  ;;  %629 = vmatpush.msra.mxu1 %v624_v39  ;;  %v618_v45 = vld [vmem:[#allocation8 + $0x48] sm:$0xff]  ;;  %s706_s12 = sshll.u32 %s702_s30, 4  ;;  %s692_s19 = scalar_lea.sflag [#allocation5], %s1379_s1  ;;  %s707_s12 = int_to_ptr.hbm [resolvable:$true] %s706_s12 }
  0x38   : > { %s1131_s24 = sshra.s32 %s707_s12, 4  ;;  %s1137_s13 = scalar_lea.hbm %s1567_s6, 16  ;;  %s1132_s24 = int_to_ptr.hbm [resolvable:$true] %s1131_s24 }
  0x39   : > { %370 = vperm.xlu1 %965, %v1405_v4   ;;  %565 = vmatpush.msra.mxu0 %v558_v36  ;;  %s1133_s29 = scalar_lea.hbm %s1132_s24, 8  ;;  %p1138_p10 = scmp.lt.s32.totalorder %s1132_s24, %s1567_s6 }
  0x3a   : > { %358 = vperm.xlu0 %964, %v1405_v4   ;;  %382 = vperm.xlu2 %966, %v1405_v4   ;;  %p1134_p1 = scmp.ne.s32.totalorder %s1132_s24, %s1133_s29  ;;  %p1139_p11 = scmp.lt.s32.totalorder %s1137_s13, %s1133_s29 }
  0x3b   : > { %566 = vmatpush.msra.mxu0 %v557_v37 }
  0x3c   : > { %p1135_p3 = pnand %p1134_p1, %p1357_p4  ;;  %p1140_p12 = por %p1139_p11, %p1138_p10 }
  0x3d   : > { %567 = vmatpush.msra.mxu0 %v556_v42  ;;  %v621_v42 = vld [vmem:[#allocation8 + $0x60] sm:$0xff] }
  0x3e   : > { %p1136_p9 = pneg %p1135_p3 }
  0x3f   : > { %568 = vmatpush.msra.mxu0 %v555_v44  ;;  %v619_v44 = vld [vmem:[#allocation8 + $0x50] sm:$0xff] }
  0x40   : > { %p1141_p13 = pnand %p1140_p12, %p1136_p9 }
  0x41   : > { %968 = vset.pattern.permute.xlu1 %v1217_v5  ;;  %569 = vmatpush.msra.mxu0 %v554_v47  ;;  %v616_v47 = vld [vmem:[#allocation8 + $0x38] sm:$0xff] }
  0x42   : > { %967 = vset.pattern.permute.xlu0 %v1217_v5  ;;  %394 = vperm.xlu1 %968, %v1405_v4  }
  0x43   : > { %390 = vperm.xlu0 %967, %v1397_v3   ;;  %969 = vset.pattern.permute.xlu2 %v1218_v6 }
  0x44   : > { %402 = vperm.xlu2 %969, %v1397_v3   ;;  %570 = vmatpush.msra.mxu0 %v553_v49  ;;  %v613_v49 = vld [vmem:[#allocation8 + $0x20] sm:$0xff] }
  0x46   : > { %571 = vmatpush.msra.mxu0 %v552_v51  ;;  %v611_v51 = vld [vmem:[#allocation8 + $0x10] sm:$0xff] }
  0x48   : > { %572 = vmatpush.msra.mxu0 %v551_v52 }
  0x4a   : > { %970 = vset.pattern.permute.xlu1 %v1218_v6  ;;  %573 = vmatpush.msra.mxu0 %v550_v54  ;;  %v610_v54 = vld [vmem:[#allocation8 + $0x8] sm:$0xff] }
  0x4b   : > { %972 = vset.pattern.permute.xlu0 %v1219_v7  ;;  %406 = vperm.xlu1 %970, %v1405_v4  }
  0x4c   : > { %418 = vperm.xlu0 %972, %v1405_v4   ;;  %971 = vset.pattern.permute.xlu2 %v1219_v7 }
  0x4d   : > { %414 = vperm.xlu2 %971, %v1397_v3   ;;  %574 = vmatpush.msra.mxu0 %v549_v58  ;;  %v663_v58 = vld [vmem:[#allocation9 + $0x68] sm:$0xff] }
  0x4f   : > { %575 = vmatpush.msra.mxu0 %v548_v60  ;;  %v661_v60 = vld [vmem:[#allocation9 + $0x58] sm:$0xff] }
  0x51   : > { %576 = vmatpush.msra.mxu0 %v547_v61 }
  0x53   : > { %973 = vset.pattern.permute.xlu1 %v1220_v8  ;;  %577 = vmatpush.msra.mxu0 %v546_v0  ;;  %v659_v0 = vld [vmem:[#allocation9 + $0x48] sm:$0xff] }
  0x54   : > { %977 = vset.pattern.permute.xlu0 %v1221_v9  ;;  %426 = vperm.xlu1 %973, %v1397_v3  }
  0x55   : > { %450 = vperm.xlu0 %977, %v1397_v3   ;;  %974 = vset.pattern.permute.xlu2 %v1220_v8 }
  0x56   : > { %430 = vperm.xlu2 %974, %v1405_v4  }
  0x5c   : > { %975 = vset.pattern.permute.xlu1 %v1222_v10 }
  0x5d   : > { %982 = vset.pattern.permute.xlu0 %v1223_v11  ;;  %438 = vperm.xlu1 %975, %v1397_v3  }
  0x5e   : > { %478 = vperm.xlu0 %982, %v1405_v4   ;;  %976 = vset.pattern.permute.xlu2 %v1222_v10 }
  0x5f   : > { %442 = vperm.xlu2 %976, %v1405_v4  }
  0x65   : > { %978 = vset.pattern.permute.xlu1 %v1221_v9 }
  0x66   : > { %987 = vset.pattern.permute.xlu0 %v1224_v12  ;;  %454 = vperm.xlu1 %978, %v1405_v4  }
  0x67   : > { %510 = vperm.xlu0 %987, %v1397_v3   ;;  %979 = vset.pattern.permute.xlu2 %v1225_v13 }
  0x68   : > { %462 = vperm.xlu2 %979, %v1397_v3  }
  0x6e   : > { %980 = vset.pattern.permute.xlu1 %v1225_v13 }
  0x6f   : > { %466 = vperm.xlu1 %980, %v1405_v4   ;;  %992 = vset.pattern.permute.xlu0 %v1226_v14 }
  0x70   : > { %981 = vset.pattern.permute.xlu2 %v1223_v11  ;;  %538 = vperm.xlu0 %992, %v1405_v4  }
  0x71   : > { %474 = vperm.xlu2 %981, %v1397_v3  }
  0x77   : > { %983 = vset.pattern.permute.xlu1 %v1227_v15 }
  0x78   : > { %486 = vperm.xlu1 %983, %v1397_v3  }
  0x79   : > { %984 = vset.pattern.permute.xlu2 %v1227_v15 }
  0x7a   : > { %490 = vperm.xlu2 %984, %v1405_v4  }
  0x80   : > { %985 = vset.pattern.permute.xlu1 %v1228_v16 }
  0x81   : > { %498 = vperm.xlu1 %985, %v1397_v3  }
  0x82   : > { %986 = vset.pattern.permute.xlu2 %v1228_v16 }
  0x83   : > { %502 = vperm.xlu2 %986, %v1405_v4  }
  0x89   : > { %988 = vset.pattern.permute.xlu1 %v1224_v12 }
  0x8a   : > { %514 = vperm.xlu1 %988, %v1405_v4  }
  0x8b   : > { %989 = vset.pattern.permute.xlu2 %v1229_v17 }
  0x8c   : > { %522 = vperm.xlu2 %989, %v1397_v3   ;;  %v1436_v18 = vpop.permute.xlu2 %378 }
  0x8d   : > { %vm380_vm8 = vcmp.eq.s32.totalorder %v1436_v18, %v1465_v48 }
  0x92   : > { %990 = vset.pattern.permute.xlu1 %v1229_v17 }
  0x93   : > { %526 = vperm.xlu1 %990, %v1405_v4  }
  0x94   : > { %991 = vset.pattern.permute.xlu2 %v1226_v14  ;;  %v1438_v19 = vpop.permute.xlu2 %382 }
  0x95   : > { %534 = vperm.xlu2 %991, %v1397_v3   ;;  %vm384_vm9 = vcmp.eq.s32.totalorder %v1438_v19, 1 }
  0x96   : > { %vm385_vm12 = vmand %vm380_vm8, %vm384_vm9 }
  0x97   : > { %v833_v1 = vsel %vm385_vm12, 1.0, %v1230_v38 }
  0x9e   : > { %v1440_v21 = vpop.permute.xlu2 %402 }
  0x9f   : > { %vm404_vm15 = vcmp.eq.s32.totalorder %v1440_v21, %v1465_v48 }
  0xa3   : > { %v367_v20 = vpop.permute.xlu1 %366 }
  0xa4   : > { %v353_v27 = vpop.permute.xlu0 %352  ;;  %vm368_vm5 = vcmp.eq.s32.totalorder %v367_v20, %v1465_v48 }
  0xa5   : > { %vm354_vm3 = vcmp.eq.s32.totalorder %v353_v27, %v1465_v48 }
  0xa7   : > { %v1442_v23 = vpop.permute.xlu2 %414 }
  0xa8   : > { %vm416_vm1 = vcmp.eq.s32.totalorder %v1442_v23, %v1465_v48 }
  0xab   : > { %v371_v22 = vpop.permute.xlu1 %370 }
  0xac   : > { %v359_v30 = vpop.permute.xlu0 %358  ;;  %vm372_vm2 = vcmp.eq.s32.totalorder %v371_v22, 1 }
  0xad   : > { %vm360_vm4 = vcmp.eq.s32.totalorder %v359_v30, 1  ;;  %vm373_vm6 = vmand %vm368_vm5, %vm372_vm2 }
  0xae   : > { %vm361_vm7 = vmand %vm354_vm3, %vm360_vm4  ;;  %v832_v56 = vsel %vm373_vm6, 1.0, %v1230_v38 }
  0xaf   : > { %v831_v57 = vsel %vm361_vm7, 1.0, %v1230_v38 }
  0xb0   : > { %v1448_v26 = vpop.permute.xlu2 %430  ;;  %v376_v62 = vadd.f32 %v832_v56, %v831_v57  ;;  %v665_v56 = vld [vmem:[#allocation9 + $0x78] sm:$0xff]  ;;  %v664_v57 = vld [vmem:[#allocation9 + $0x70] sm:$0xff] }
  0xb1   : > { %vm432_vm3 = vcmp.eq.s32.totalorder %v1448_v26, 1  ;;  %670 = vmatpush.msra.mxu2 %v665_v56 }
  0xb2   : > { %v388_v3 = vadd.f32 %v833_v1, %v376_v62  ;;  %v660_v62 = vld [vmem:[#allocation9 + $0x50] sm:$0xff]  ;;  %v658_v1 = vld [vmem:[#allocation9 + $0x40] sm:$0xff] }
  0xb3   : > { %671 = vmatpush.msra.mxu2 %v664_v57 }
  0xb4   : > { %v1444_v24 = vpop.permute.xlu1 %394 }
  0xb5   : > { %v391_v40 = vpop.permute.xlu0 %390  ;;  %vm396_vm10 = vcmp.eq.s32.totalorder %v1444_v24, 1  ;;  %672 = vmatpush.msra.mxu2 %v663_v58 }
  0xb6   : > { %vm392_vm11 = vcmp.eq.s32.totalorder %v391_v40, %v1465_v48  ;;  %v623_v40 = vld [vmem:[#allocation8 + $0x70] sm:$0xff] }
  0xb7   : > { %vm397_vm14 = vmand %vm392_vm11, %vm396_vm10  ;;  %630 = vmatpush.msra.mxu1 %v623_v40 }
  0xb8   : > { %v834_v2 = vsel %vm397_vm14, 1.0, %v1230_v38 }
  0xb9   : > { %v1452_v29 = vpop.permute.xlu2 %442  ;;  %v400_v6 = vadd.f32 %v834_v2, %v388_v3  ;;  %v657_v3 = vld [vmem:[#allocation9 + $0x38] sm:$0xff] }
  0xba   : > { %vm444_vm6 = vcmp.eq.s32.totalorder %v1452_v29, 1 }
  0xbd   : > { %v1446_v25 = vpop.permute.xlu1 %406  ;;  %590 = vadd.xlane.f32.xlu1 %v589_v41  ;;  %v622_v41 = vld [vmem:[#allocation8 + $0x68] sm:$0xff] }
  0xbe   : > { %v419_v50 = vpop.permute.xlu0 %418  ;;  %vm408_vm13 = vcmp.eq.s32.totalorder %v1446_v25, 1  ;;  %631 = vmatpush.msra.mxu1 %v622_v41 }
  0xbf   : > { %vm409_vm0 = vmand %vm404_vm15, %vm408_vm13  ;;  %vm420_vm2 = vcmp.eq.s32.totalorder %v419_v50, 1  ;;  %v612_v50 = vld [vmem:[#allocation8 + $0x18] sm:$0xff] }
  0xc0   : > { %v835_v5 = vsel %vm409_vm0, 1.0, %v1230_v38  ;;  %vm421_vm5 = vmand %vm416_vm1, %vm420_vm2  ;;  %632 = vmatpush.msra.mxu1 %v621_v42 }
  0xc1   : > { %v412_v8 = vadd.f32 %v835_v5, %v400_v6  ;;  %v836_v9 = vsel %vm421_vm5, 1.0, %v1230_v38  ;;  %v655_v6 = vld [vmem:[#allocation9 + $0x28] sm:$0xff] }
  0xc2   : > { %v1456_v34 = vpop.permute.xlu2 %462 }
  0xc3   : > { %v424_v12 = vadd.f32 %v836_v9, %v412_v8  ;;  %vm464_vm14 = vcmp.eq.s32.totalorder %v1456_v34, %v1465_v48 }
  0xc6   : > { %v1450_v28 = vpop.permute.xlu1 %426 }
  0xc7   : > { %v451_v59 = vpop.permute.xlu0 %450  ;;  %vm428_vm4 = vcmp.eq.s32.totalorder %v1450_v28, %v1465_v48 }
  0xc8   : > { %vm433_vm8 = vmand %vm428_vm4, %vm432_vm3  ;;  %vm452_vm10 = vcmp.eq.s32.totalorder %v451_v59, %v1465_v48  ;;  %v662_v59 = vld [vmem:[#allocation9 + $0x60] sm:$0xff] }
  0xc9   : > { %v837_v11 = vsel %vm433_vm8, 1.0, %v1230_v38  ;;  %673 = vmatpush.msra.mxu2 %v662_v59 }
  0xca   : > { %v436_v15 = vadd.f32 %v837_v11, %v424_v12  ;;  %v653_v11 = vld [vmem:[#allocation9 + $0x18] sm:$0xff] }
  0xcb   : > { %v1463_v46 = vpop.permute.xlu2 %474  ;;  %674 = vmatpush.msra.mxu2 %v661_v60 }
  0xcc   : > { %vm476_vm0 = vcmp.eq.s32.totalorder %v1463_v46, %v1465_v48  ;;  %v617_v46 = vld [vmem:[#allocation8 + $0x40] sm:$0xff] }
  0xcd   : > { %675 = vmatpush.msra.mxu2 %v660_v62 }
  0xcf   : > { %v1454_v33 = vpop.permute.xlu1 %438  ;;  %676 = vmatpush.msra.mxu2 %v659_v0 }
  0xd0   : > { %v479_v7 = vpop.permute.xlu0 %478  ;;  %vm440_vm7 = vcmp.eq.s32.totalorder %v1454_v33, %v1465_v48 }
  0xd1   : > { %vm445_vm11 = vmand %vm440_vm7, %vm444_vm6  ;;  %vm480_vm1 = vcmp.eq.s32.totalorder %v479_v7, 1  ;;  %677 = vmatpush.msra.mxu2 %v658_v1  ;;  %v654_v7 = vld [vmem:[#allocation9 + $0x20] sm:$0xff] }
  0xd2   : > { %v838_v14 = vsel %vm445_vm11, 1.0, %v1230_v38  ;;  %vm481_vm4 = vmand %vm476_vm0, %vm480_vm1 }
  0xd3   : > { %v448_v18 = vadd.f32 %v838_v14, %v436_v15  ;;  %v841_v23 = vsel %vm481_vm4, 1.0, %v1230_v38  ;;  %678 = vmatpush.msra.mxu2 %v657_v3 }
  0xd4   : > { %v1469_v55 = vpop.permute.xlu2 %490 }
  0xd5   : > { %vm492_vm2 = vcmp.eq.s32.totalorder %v1469_v55, 1  ;;  %v609_v55 = vld [vmem:[#allocation8] sm:$0xff] }
  0xd8   : > { %v1461_v43 = vpop.permute.xlu1 %454 }
  0xd9   : > { %vm456_vm9 = vcmp.eq.s32.totalorder %v1461_v43, 1  ;;  %v511_v16 = vpop.permute.xlu0 %510  ;;  %v620_v43 = vld [vmem:[#allocation8 + $0x58] sm:$0xff] }
  0xda   : > { %vm457_vm13 = vmand %vm452_vm10, %vm456_vm9  ;;  %vm512_vm9 = vcmp.eq.s32.totalorder %v511_v16, %v1465_v48  ;;  %633 = vmatpush.msra.mxu1 %v620_v43 }
  0xdb   : > { %v839_v17 = vsel %vm457_vm13, 1.0, %v1230_v38 }
  0xdc   : > { %v460_v20 = vadd.f32 %v839_v17, %v448_v18  ;;  %634 = vmatpush.msra.mxu1 %v619_v44  ;;  %v652_v17 = vld [vmem:[#allocation9 + $0x10] sm:$0xff]  ;;  %v651_v18 = vld [vmem:[#allocation9 + $0x8] sm:$0xff] }
  0xdd   : > { %v503_v4 = vpop.permute.xlu2 %502 }
  0xde   : > { %vm504_vm5 = vcmp.eq.s32.totalorder %v503_v4, 1  ;;  %635 = vmatpush.msra.mxu1 %v618_v45  ;;  %v656_v4 = vld [vmem:[#allocation9 + $0x30] sm:$0xff] }
  0xdf   : > { %679 = vmatpush.msra.mxu2 %v656_v4 }
  0xe0   : > { %636 = vmatpush.msra.mxu1 %v617_v46 }
  0xe1   : > { %v467_v53 = vpop.permute.xlu1 %466  ;;  %680 = vmatpush.msra.mxu2 %v655_v6 }
  0xe2   : > { %vm468_vm12 = vcmp.eq.s32.totalorder %v467_v53, 1  ;;  %v539_v25 = vpop.permute.xlu0 %538  ;;  %637 = vmatpush.msra.mxu1 %v616_v47 }
  0xe3   : > { %vm469_vm15 = vmand %vm464_vm14, %vm468_vm12  ;;  %vm540_vm13 = vcmp.eq.s32.totalorder %v539_v25, 1  ;;  %681 = vmatpush.msra.mxu2 %v654_v7 }
  0xe4   : > { %v840_v19 = vsel %vm469_vm15, 1.0, %v1230_v38 }
  0xe5   : > { %v472_v22 = vadd.f32 %v840_v19, %v460_v20  ;;  %682 = vmatpush.msra.mxu2 %v653_v11  ;;  %v650_v19 = vld [vmem:[#allocation9] sm:$0xff]  ;;  %v993_v20 = vld [vmem:[%s1564_s3] ss:$0 sm:$0xff] }
  0xe6   : > { %v523_v13 = vpop.permute.xlu2 %522 }
  0xe7   : > { %v484_v27 = vadd.f32 %v841_v23, %v472_v22  ;;  %vm524_vm15 = vcmp.eq.s32.totalorder %v523_v13, %v1465_v48  ;;  %683 = vmatpush.msra.mxu2 %v652_v17 }
  0xe9   : > { %684 = vmatpush.msra.mxu2 %v651_v18 }
  0xea   : > { %v487_v63 = vpop.permute.xlu1 %486 }
  0xeb   : > { %vm488_vm3 = vcmp.eq.s32.totalorder %v487_v63, %v1465_v48  ;;  %685 = vmatpush.msra.mxu2 %v650_v19 }
  0xec   : > { %vm493_vm7 = vmand %vm488_vm3, %vm492_vm2 }
  0xed   : > { %v842_v26 = vsel %vm493_vm7, 1.0, %v1230_v38 }
  0xee   : > { %v496_v29 = vadd.f32 %v842_v26, %v484_v27 }
  0xef   : > { %v535_v24 = vpop.permute.xlu2 %534 }
  0xf0   : > { %vm536_vm12 = vcmp.eq.s32.totalorder %v535_v24, %v1465_v48  ;;  %v994_v24 = vld [vmem:[%s1566_s5] ss:$0 sm:$0xff] }
  0xf1   : > { %vm541_vm14 = vmand %vm536_vm12, %vm540_vm13 }
  0xf2   : > { %v846_v35 = vsel %vm541_vm14, 1.0, %v1230_v38 }
  0xf3   : > { %v499_v10 = vpop.permute.xlu1 %498 }
  0xf4   : > { %vm500_vm6 = vcmp.eq.s32.totalorder %v499_v10, %v1465_v48  ;;  %v614_v48 = vld [vmem:[#allocation8 + $0x28] sm:$0xff] }
  0xf5   : > { %vm505_vm10 = vmand %vm500_vm6, %vm504_vm5 }
  0xf6   : > { %v843_v28 = vsel %vm505_vm10, 1.0, %v1230_v38 }
  0xf7   : > { %v508_v31 = vadd.f32 %v843_v28, %v496_v29 }
  0xfc   : > { %v515_v21 = vpop.permute.xlu1 %514 }
  0xfd   : > { %vm516_vm8 = vcmp.eq.s32.totalorder %v515_v21, 1 }
  0xfe   : > { %vm517_vm11 = vmand %vm512_vm9, %vm516_vm8 }
  0xff   : > { %v844_v30 = vsel %vm517_vm11, 1.0, %v1230_v38 }
 0x100   : > { %v520_v33 = vadd.f32 %v844_v30, %v508_v31 }
 0x105   : > { %v527_v32 = vpop.permute.xlu1 %526 }
 0x106   : > { %vm528_vm0 = vcmp.eq.s32.totalorder %v527_v32, 1 }
 0x107   : > { %vm529_vm1 = vmand %vm524_vm15, %vm528_vm0 }
 0x108   : > { %v845_v34 = vsel %vm529_vm1, 1.0, %v1230_v38  ;;  %v615_v38 = vld [vmem:[#allocation8 + $0x30] sm:$0xff] }
 0x109   : > { %v532_v36 = vadd.f32 %v845_v34, %v520_v33  ;;  %638 = vmatpush.msra.mxu1 %v615_v38 }
 0x10b   : > { %v544_v37 = vadd.f32 %v846_v35, %v532_v36  ;;  %639 = vmatpush.msra.mxu1 %v614_v48 }
 0x10d   : > { %578 = vmatmul.f32.vlgmr.msra.gmra.mxu0 %v544_v37  ;;  %640 = vmatpush.msra.mxu1 %v613_v49 }
 0x10f   : > { %641 = vmatpush.msra.mxu1 %v612_v50 }
 0x111   : > { %642 = vmatpush.msra.mxu1 %v611_v51 }
 0x113   : > { %643 = vmatpush.msra.mxu1 %v610_v54 }
 0x115   : > { %644 = vmatpush.msra.mxu1 %v609_v55 }
 0x130   : > { %v591_v52 = vpop.xlane.xlu1 %590 }
 0x131   : > { %v592_v53 = vmax.f32 %v591_v52, 1e-13 }
 0x133   : > { %995 = vrcp.f32 %v592_v53  ;;  %vm598_vm2 = vweird.f32 %v592_v53  ;;  %v604_v8 = vand.u32 2147483648, %v592_v53  ;;  %v602_v10 = vand.u32 2147483647, %v592_v53 }
 0x135   : > { %v605_v12 = vor.u32 1.1754944e-38, %v604_v8  ;;  %vm603_vm5 = vcmp.eq.f32.partialorder %v602_v10, 8.507059e+37 }
 0x139   : > { %v996_v61 = vpop.eup %995 }
 0x13a   : > { %v594_v63 = vmul.f32 %v996_v61, %v592_v53  ;;  %vm599_vm3 = vweird.f32 %v996_v61 }
 0x13b   : > { %vm600_vm4 = vmor %vm598_vm2, %vm599_vm3 }
 0x13c   : > { %v595_v2 = vsub.f32 1.0, %v594_v63 }
 0x13e   : > { %v596_v5 = vmul.f32 %v996_v61, %v595_v2 }
 0x140   : > { %v597_v9 = vadd.f32 %v996_v61, %v596_v5 }
 0x142   : > { %v601_v13 = vsel %vm600_vm4, %v996_v61, %v597_v9 }
 0x143   : > { %v606_v15 = vsel %vm603_vm5, %v605_v12, %v601_v13 }
 0x18a   : > { %v579_v14 = vpop.f32.mrf.mxu0 }
 0x18b   : > { %v608_v16 = vmul.f32 %v606_v15, %v579_v14 }
 0x18d   : > { %645 = vmatmul.f32.vlgmr.msra.gmra.mxu1 %v608_v16 }
 0x20a   : > { %v646_v21 = vpop.f32.mrf.mxu1 }
 0x20b   : > { %v647_v22 = vadd.f32 %v993_v20, %v646_v21 }
 0x20d   : > { %v649_v23 = vmax.f32 %v647_v22, 0.0 }
 0x20f   : > { %686 = vmatmul.f32.vlgmr.msra.gmra.mxu2 %v649_v23 }
 0x292   : > { %v687_v25 = vpop.f32.mrf.mxu2 }
 0x293   : > { %v688_v26 = vadd.f32 %v994_v24, %v687_v25 }
 0x295   : > { %690 = vst [vmem:[%s338_s7] sm:$0xff] %v688_v26 }
 0x296   : > { %1144 = shalt.err (!%p1141_p13)
}
 0x297   : > { %866 = dma.vmem_to_hbm [thread:$0]  (%p1357_p4), %s705_s14, 128, %s707_s12, %s692_s19  }
 0x298 PF: > { %s718_s1 = sand.u32 1, %s1187_s21   ;;  %p883_p0 = pnand %p822_p6, %p1365_p7 }
 0x299   : > { %s719_s18 = scalar_lea.sflag [#allocation5], %s718_s1 }
 0x29a   : > { %p884_p2 = pneg %p883_p0 }
 0x29c   : > { %1182 = dma.done.wait (%p884_p2), %s719_s18, 128  }
 0x29d   : > { %1184 = vsyncadd (%p884_p2), %s719_s18, 4294967168  ;;  %s24_s26 = sadd.s32 1, %s1207_s26   ;;  %s1577_s21 = smov %s1191_s22 }
 0x29e   : > { %p21_p5 = scmp.ge.s32.totalorder %s24_s26, 4   ;;  %s1578_s22 = smov %s1195_s23 }
 0x29f   : > { %s1579_s23 = smov %s1363_s16  ;;  %s1580_s24 = smov %s1203_s25 }
 0x2a0   : > { %s1581_s25 = smov %s1583_s10  ;;  %23 = sbr.rel (!%p21_p5) target bundleno = 10 (0xa), region = 110 }
 0x2a5   :  { %725 = vsyncpa [#allocation4], 1 }
 0x2a6   :  { %727 = vsyncpa [#allocation4 + $0x1], 1 }
 0x2a7   :  { %728 = vsyncpa [#allocation7], 1 }
 0x2a8   :  { %729 = vsyncpa [#allocation10], 1 }
 0x2a9   :  { %730 = vsyncpa [#allocation5], 1 }
 0x2aa   :  { %732 = vsyncpa [#allocation5 + $0x1], 1 }

</bundles_post_ra>
